<compile_context>
chip_gen: v7x
topology: tpu7x:2x2x1
jax: 0.10.0
libtpu: 0.0.40
codegen_flags: <defaults>
</compile_context>

<pallas_src>
import functools

import numpy as np
import jax
import jax.numpy as jnp
from jax import lax
from jax.experimental import pallas as pl
from jax.experimental.pallas import tpu as pltpu

NEG_SLOPE = 0.01   # nn.LeakyReLU() default
BN_EPS = 1e-5      # nn.BatchNorm2d default


def _round_up(a, m):
    return (a + m - 1) // m * m


def _subpixel_phases(K, S, P):
    """Sub-pixel decomposition of a 1-D transposed conv (stride S, pad P, kernel K).

    For output index oh = S*q + r the transposed conv reduces to a stride-1
    correlation on the *undilated* input:
        y[S*q + r] = sum_j x[q + base_r + j] * w[kh_r[j]]
    Returns, per phase r, (base_r, [kh_r[0], kh_r[1], ...]).
    """
    phases = []
    for r in range(S):
        c = (r + P) % S
        khs_fwd = list(range(c, K, S))            # kernel taps hitting this phase
        if not khs_fwd:
            phases.append((0, []))
            continue
        T = len(khs_fwd)
        off = (r + P - c) // S
        phases.append((off - (T - 1), khs_fwd[::-1]))
    return phases


def _fused_kernel(x_ref, wd_ref, bd_ref, wpT_ref, bp_ref, gamma_ref, beta_ref,
                  mask_ref, out_ref, *, tap_plan, L_pad, count):
    """Depthwise transposed conv (sub-pixel taps, flat spatial axis on lanes) +
    pointwise 1x1 conv on the MXU (lane-dense (C_out, spatial) result) +
    fused batch-stat BatchNorm + LeakyReLU, all in one grid step."""
    x = x_ref[...]                 # (C_in, X_width)  compact-padded, flattened N*H*W
    wd = wd_ref[...]               # (C_in, K*K)      depthwise weights
    bd = bd_ref[...]               # (C_in, 1)        depthwise bias

    # Depthwise transposed conv: per sub-pixel phase, a few shifted flat slices
    # scaled by a per-channel weight.  Lane axis = flattened spatial -> dense VPU.
    accs = []
    for taps in tap_plan:                              # one entry per (rh, rw) phase
        acc = jnp.zeros((x.shape[0], L_pad), jnp.float32)
        for off, widx in taps:                         # static ints -> static slices
            acc = acc + x[:, off:off + L_pad] * wd[:, widx:widx + 1]
        accs.append(acc + bd)
    acc_all = jnp.concatenate(accs, axis=1)            # (C_in, S*S*L_pad), 128-aligned

    # Pointwise 1x1 transposed conv == channel matmul, computed transposed so the
    # result (and the store) is lane-dense: (C_out, S*S*L_pad).
    z = jnp.dot(wpT_ref[...], acc_all,
                preferred_element_type=jnp.float32) + bp_ref[...]

    # BatchNorm (training-mode batch statistics) over the valid columns only.
    mask = jnp.concatenate([mask_ref[...]] * len(tap_plan), axis=1)  # (1, S*S*L_pad)
    inv_cnt = 1.0 / count
    mean = jnp.sum(z * mask, axis=1, keepdims=True) * inv_cnt        # (C_out, 1)
    cen = (z - mean) * mask
    var = jnp.sum(cen * cen, axis=1, keepdims=True) * inv_cnt        # biased, two-pass
    inv_std = lax.rsqrt(var + BN_EPS)
    scale = gamma_ref[...] * inv_std
    shift = beta_ref[...] - mean * scale

    zn = z * scale + shift
    out_ref[...] = jnp.where(zn > 0, zn, NEG_SLOPE * zn)


def conv_transpose_bn_lrelu(x, params, *, kernel, stride, padding):
    """x: (N, C_in, H, W) float32, NCHW (PyTorch convention). Returns NCHW."""
    N, C_in, H, W = x.shape
    K, S, P = kernel, stride, padding
    C_out = params["bp"].shape[0]
    H_out = (H - 1) * S - 2 * P + K
    W_out = (W - 1) * S - 2 * P + K
    # TODO(synk): (K - 2P) % S != 0 needs per-phase output lengths; the usual
    # upsampling configs (K=4,S=2,P=1 / K=2,S=2,P=0 / S=1) all satisfy this.
    assert H_out % S == 0 and W_out % S == 0
    Hq, Wq = H_out // S, W_out // S

    phases = _subpixel_phases(K, S, P)                  # square kernel: same for H/W
    pad_l = max([0] + [-b for b, k in phases if k])
    reach = max([0] + [b + len(k) - 1 for b, k in phases if k])
    H_pad = H + pad_l + max(0, reach + Hq - H)
    W_pad = W + pad_l + max(0, reach + Wq - W)
    HpWp = H_pad * W_pad

    # Flat-column bookkeeping: output (n, qh, qw) of every phase lives at column
    # n*HpWp + qh*W_pad + qw; other columns are junk (masked for BN, dropped later).
    L_pad = _round_up((N - 1) * HpWp + Hq * W_pad, 128)   # lane-dense per-phase width
    off_max = (pad_l + reach) * W_pad + (pad_l + reach)
    X_width = _round_up(max(N * HpWp, L_pad + off_max), 128)

    # Static tap plan: per (rh, rw) phase, list of (flat input offset, wd index).
    tap_plan = []
    for bh, khs in phases:
        for bw, kws in phases:
            taps = []
            for jh, kh in enumerate(khs):
                for jw, kw in enumerate(kws):
                    taps.append(((pad_l + bh + jh) * W_pad + (pad_l + bw + jw),
                                 kh * K + kw))
            tap_plan.append(tuple(taps))
    tap_plan = tuple(tap_plan)

    # --- glue: compact pad + layout only (no S-fold zero insertion) ---
    xp = jnp.pad(x.astype(jnp.float32),
                 ((0, 0), (0, 0),
                  (pad_l, H_pad - H - pad_l), (pad_l, W_pad - W - pad_l)))
    x_flat = jnp.transpose(xp, (1, 0, 2, 3)).reshape(C_in, N * HpWp)
    x_flat = jnp.pad(x_flat, ((0, 0), (0, X_width - N * HpWp)))

    wd = params["wd"][:, 0].reshape(C_in, K * K).astype(jnp.float32)
    bd = params["bd"].reshape(C_in, 1).astype(jnp.float32)
    wpT = jnp.transpose(params["wp"][:, :, 0, 0]).astype(jnp.float32)    # (C_out, C_in)
    bp = params["bp"].reshape(C_out, 1).astype(jnp.float32)
    gamma = params["gamma"].reshape(C_out, 1).astype(jnp.float32)
    beta = params["beta"].reshape(C_out, 1).astype(jnp.float32)

    # Validity mask of flat columns (identical for every phase), built statically.
    ii = np.arange(L_pad)
    loc = ii % HpWp
    valid = (ii // HpWp < N) & (loc // W_pad < Hq) & (loc % W_pad < Wq)
    mask = jnp.asarray(valid[None, :].astype(np.float32))                # (1, L_pad)

    n_phase = S * S
    kern = functools.partial(_fused_kernel, tap_plan=tap_plan, L_pad=L_pad,
                             count=float(N * H_out * W_out))

    z_flat = pl.pallas_call(
        kern,
        out_shape=jax.ShapeDtypeStruct((C_out, n_phase * L_pad), jnp.float32),
        grid_spec=pltpu.PrefetchScalarGridSpec(
            num_scalar_prefetch=0,
            grid=(1,),
            in_specs=[
                pl.BlockSpec((C_in, X_width), lambda i: (0, 0)),
                pl.BlockSpec((C_in, K * K), lambda i: (0, 0)),
                pl.BlockSpec((C_in, 1), lambda i: (0, 0)),
                pl.BlockSpec((C_out, C_in), lambda i: (0, 0)),
                pl.BlockSpec((C_out, 1), lambda i: (0, 0)),
                pl.BlockSpec((C_out, 1), lambda i: (0, 0)),
                pl.BlockSpec((C_out, 1), lambda i: (0, 0)),
                pl.BlockSpec((1, L_pad), lambda i: (0, 0)),
            ],
            out_specs=pl.BlockSpec((C_out, n_phase * L_pad), lambda i: (0, 0)),
        ),
        compiler_params=pltpu.CompilerParams(
            dimension_semantics=("arbitrary",)),
    )(x_flat, wd, bd, wpT, bp, gamma, beta, mask)

    # --- glue: un-flatten + interleave the S*S sub-pixel phases back to NCHW ---
    z = z_flat.reshape(C_out, S, S, L_pad)
    imgs = []
    for n in range(N):
        blk = z[:, :, :, n * HpWp:n * HpWp + Hq * W_pad]
        blk = blk.reshape(C_out, S, S, Hq, W_pad)[..., :Wq]
        # (d, rh, rw, qh, qw) -> (d, qh*S+rh, qw*S+rw)
        imgs.append(jnp.transpose(blk, (0, 3, 1, 4, 2)).reshape(C_out, H_out, W_out))
    return jnp.stack(imgs, axis=0)


def reference(x, params, *, kernel, stride, padding):
    """Pure-JAX (XLA conv) reference with identical semantics, for validation."""
    K, S, P = kernel, stride, padding
    C_in = x.shape[1]
    pad = K - 1 - P
    w_flip = params["wd"][:, :, ::-1, ::-1]
    y = lax.conv_general_dilated(
        x, w_flip, window_strides=(1, 1),
        padding=[(pad, pad), (pad, pad)],
        lhs_dilation=(S, S),
        dimension_numbers=("NCHW", "OIHW", "NCHW"),
        feature_group_count=C_in,
        precision=lax.Precision.HIGHEST)
    y = y + params["bd"][None, :, None, None]
    wp = params["wp"][:, :, 0, 0]
    z = jnp.einsum("nchw,cd->ndhw", y, wp, precision=lax.Precision.HIGHEST)
    z = z + params["bp"][None, :, None, None]
    mean = z.mean(axis=(0, 2, 3), keepdims=True)
    var = z.var(axis=(0, 2, 3), keepdims=True)      # biased (PyTorch training-mode BN)
    zn = (z - mean) / jnp.sqrt(var + BN_EPS)
    zn = zn * params["gamma"][None, :, None, None] + params["beta"][None, :, None, None]
    return jnp.where(zn > 0, zn, NEG_SLOPE * zn)


if __name__ == "__main__":
    N, C_in, C_out, H, W = 2, 4, 8, 16, 16
    K, S, P = 4, 2, 1                       # ConvTranspose2d(kernel=4, stride=2, padding=1)

    key = jax.random.PRNGKey(0)
    ks = jax.random.split(key, 7)
    x = jax.random.normal(ks[0], (N, C_in, H, W), jnp.float32)
    params = {
        "wd": 0.2 * jax.random.normal(ks[1], (C_in, 1, K, K), jnp.float32),
        "bd": 0.1 * jax.random.normal(ks[2], (C_in,), jnp.float32),
        "wp": 0.2 * jax.random.normal(ks[3], (C_in, C_out, 1, 1), jnp.float32),
        "bp": 0.1 * jax.random.normal(ks[4], (C_out,), jnp.float32),
        "gamma": 1.0 + 0.1 * jax.random.normal(ks[5], (C_out,), jnp.float32),
        "beta": 0.1 * jax.random.normal(ks[6], (C_out,), jnp.float32),
    }

    fwd = jax.jit(functools.partial(conv_transpose_bn_lrelu,
                                    kernel=K, stride=S, padding=P))
    out = jax.block_until_ready(fwd(x, params))

    H_out = (H - 1) * S - 2 * P + K
    W_out = (W - 1) * S - 2 * P + K
    assert out.shape == (N, C_out, H_out, W_out), out.shape

    ref = reference(x, params, kernel=K, stride=S, padding=P)
    max_err = float(jnp.max(jnp.abs(out - ref)))
    # The 1x1 matmul now uses default MXU precision (single bf16 pass, per the perf
    # review) instead of Precision.HIGHEST; BN's 1/std (~6x here) amplifies that
    # quantization, so validate at 1e-2 against the f32-accurate reference.
    assert jnp.allclose(out, ref, atol=1e-2, rtol=1e-2), f"max_err={max_err}"

    print("KERNEL_OK")
</pallas_src>

<mosaic_0001>
module attributes {stable_mosaic.version = 11 : i64} {
  func.func @_fused_kernel(%arg0: i32, %arg1: memref<4x768xf32, #tpu.memory_space<vmem>>, %arg2: memref<4x16xf32, #tpu.memory_space<vmem>>, %arg3: memref<4x1xf32, #tpu.memory_space<vmem>>, %arg4: memref<8x4xf32, #tpu.memory_space<vmem>>, %arg5: memref<8x1xf32, #tpu.memory_space<vmem>>, %arg6: memref<8x1xf32, #tpu.memory_space<vmem>>, %arg7: memref<8x1xf32, #tpu.memory_space<vmem>>, %arg8: memref<1x640xf32, #tpu.memory_space<vmem>>, %arg9: memref<8x2560xf32, #tpu.memory_space<vmem>>) attributes {dimension_semantics = [#tpu.dimension_semantics<arbitrary>], iteration_bounds = array<i64: 1>, scalar_prefetch = 0 : i64, scratch_operands = 0 : i64, tpu.core_type = #tpu.core_type<tc>, window_params = [{pipeline_mode = #tpu.pipeline_mode<synchronous>, transform_indices = @transform_0, window_bounds = array<i64: 4, 768>}, {pipeline_mode = #tpu.pipeline_mode<synchronous>, transform_indices = @transform_1, window_bounds = array<i64: 4, 16>}, {pipeline_mode = #tpu.pipeline_mode<synchronous>, transform_indices = @transform_2, window_bounds = array<i64: 4, 1>}, {pipeline_mode = #tpu.pipeline_mode<synchronous>, transform_indices = @transform_3, window_bounds = array<i64: 8, 4>}, {pipeline_mode = #tpu.pipeline_mode<synchronous>, transform_indices = @transform_4, window_bounds = array<i64: 8, 1>}, {pipeline_mode = #tpu.pipeline_mode<synchronous>, transform_indices = @transform_5, window_bounds = array<i64: 8, 1>}, {pipeline_mode = #tpu.pipeline_mode<synchronous>, transform_indices = @transform_6, window_bounds = array<i64: 8, 1>}, {pipeline_mode = #tpu.pipeline_mode<synchronous>, transform_indices = @transform_7, window_bounds = array<i64: 1, 640>}, {pipeline_mode = #tpu.pipeline_mode<synchronous>, transform_indices = @transform_8, window_bounds = array<i64: 8, 2560>}]} {
    %c0 = arith.constant 0 : index
    %c0_0 = arith.constant 0 : index
    %0 = vector.load %arg1[%c0, %c0_0] : memref<4x768xf32, #tpu.memory_space<vmem>>, vector<4x768xf32>
    %c0_1 = arith.constant 0 : index
    %c0_2 = arith.constant 0 : index
    %1 = vector.load %arg2[%c0_1, %c0_2] : memref<4x16xf32, #tpu.memory_space<vmem>>, vector<4x16xf32>
    %c0_3 = arith.constant 0 : index
    %c0_4 = arith.constant 0 : index
    %2 = vector.load %arg3[%c0_3, %c0_4] : memref<4x1xf32, #tpu.memory_space<vmem>>, vector<4x1xf32>
    %cst = arith.constant 0.000000e+00 : f32
    %3 = vector.broadcast %cst : f32 to vector<4x640xf32>
    %4 = vector.extract_strided_slice %0 {offsets = [0, 0], sizes = [4, 640], strides = [1, 1]} : vector<4x768xf32> to vector<4x640xf32>
    %5 = vector.extract_strided_slice %1 {offsets = [0, 15], sizes = [4, 1], strides = [1, 1]} : vector<4x16xf32> to vector<4x1xf32>
    %6 = vector.broadcast %5 : vector<4x1xf32> to vector<4x640xf32>
    %7 = arith.mulf %4, %6 : vector<4x640xf32>
    %8 = arith.addf %3, %7 : vector<4x640xf32>
    %9 = vector.extract_strided_slice %0 {offsets = [0, 1], sizes = [4, 640], strides = [1, 1]} : vector<4x768xf32> to vector<4x640xf32>
    %10 = vector.extract_strided_slice %1 {offsets = [0, 13], sizes = [4, 1], strides = [1, 1]} : vector<4x16xf32> to vector<4x1xf32>
    %11 = vector.broadcast %10 : vector<4x1xf32> to vector<4x640xf32>
    %12 = arith.mulf %9, %11 : vector<4x640xf32>
    %13 = arith.addf %8, %12 : vector<4x640xf32>
    %14 = vector.extract_strided_slice %0 {offsets = [0, 18], sizes = [4, 640], strides = [1, 1]} : vector<4x768xf32> to vector<4x640xf32>
    %15 = vector.extract_strided_slice %1 {offsets = [0, 7], sizes = [4, 1], strides = [1, 1]} : vector<4x16xf32> to vector<4x1xf32>
    %16 = vector.broadcast %15 : vector<4x1xf32> to vector<4x640xf32>
    %17 = arith.mulf %14, %16 : vector<4x640xf32>
    %18 = arith.addf %13, %17 : vector<4x640xf32>
    %19 = vector.extract_strided_slice %0 {offsets = [0, 19], sizes = [4, 640], strides = [1, 1]} : vector<4x768xf32> to vector<4x640xf32>
    %20 = vector.extract_strided_slice %1 {offsets = [0, 5], sizes = [4, 1], strides = [1, 1]} : vector<4x16xf32> to vector<4x1xf32>
    %21 = vector.broadcast %20 : vector<4x1xf32> to vector<4x640xf32>
    %22 = arith.mulf %19, %21 : vector<4x640xf32>
    %23 = arith.addf %18, %22 : vector<4x640xf32>
    %24 = vector.broadcast %2 : vector<4x1xf32> to vector<4x640xf32>
    %25 = arith.addf %23, %24 : vector<4x640xf32>
    %cst_5 = arith.constant 0.000000e+00 : f32
    %26 = vector.broadcast %cst_5 : f32 to vector<4x640xf32>
    %27 = vector.extract_strided_slice %0 {offsets = [0, 1], sizes = [4, 640], strides = [1, 1]} : vector<4x768xf32> to vector<4x640xf32>
    %28 = vector.extract_strided_slice %1 {offsets = [0, 14], sizes = [4, 1], strides = [1, 1]} : vector<4x16xf32> to vector<4x1xf32>
    %29 = vector.broadcast %28 : vector<4x1xf32> to vector<4x640xf32>
    %30 = arith.mulf %27, %29 : vector<4x640xf32>
    %31 = arith.addf %26, %30 : vector<4x640xf32>
    %32 = vector.extract_strided_slice %0 {offsets = [0, 2], sizes = [4, 640], strides = [1, 1]} : vector<4x768xf32> to vector<4x640xf32>
    %33 = vector.extract_strided_slice %1 {offsets = [0, 12], sizes = [4, 1], strides = [1, 1]} : vector<4x16xf32> to vector<4x1xf32>
    %34 = vector.broadcast %33 : vector<4x1xf32> to vector<4x640xf32>
    %35 = arith.mulf %32, %34 : vector<4x640xf32>
    %36 = arith.addf %31, %35 : vector<4x640xf32>
    %37 = vector.extract_strided_slice %0 {offsets = [0, 19], sizes = [4, 640], strides = [1, 1]} : vector<4x768xf32> to vector<4x640xf32>
    %38 = vector.extract_strided_slice %1 {offsets = [0, 6], sizes = [4, 1], strides = [1, 1]} : vector<4x16xf32> to vector<4x1xf32>
    %39 = vector.broadcast %38 : vector<4x1xf32> to vector<4x640xf32>
    %40 = arith.mulf %37, %39 : vector<4x640xf32>
    %41 = arith.addf %36, %40 : vector<4x640xf32>
    %42 = vector.extract_strided_slice %0 {offsets = [0, 20], sizes = [4, 640], strides = [1, 1]} : vector<4x768xf32> to vector<4x640xf32>
    %43 = vector.extract_strided_slice %1 {offsets = [0, 4], sizes = [4, 1], strides = [1, 1]} : vector<4x16xf32> to vector<4x1xf32>
    %44 = vector.broadcast %43 : vector<4x1xf32> to vector<4x640xf32>
    %45 = arith.mulf %42, %44 : vector<4x640xf32>
    %46 = arith.addf %41, %45 : vector<4x640xf32>
    %47 = vector.broadcast %2 : vector<4x1xf32> to vector<4x640xf32>
    %48 = arith.addf %46, %47 : vector<4x640xf32>
    %cst_6 = arith.constant 0.000000e+00 : f32
    %49 = vector.broadcast %cst_6 : f32 to vector<4x640xf32>
    %50 = vector.extract_strided_slice %0 {offsets = [0, 18], sizes = [4, 640], strides = [1, 1]} : vector<4x768xf32> to vector<4x640xf32>
    %51 = vector.extract_strided_slice %1 {offsets = [0, 11], sizes = [4, 1], strides = [1, 1]} : vector<4x16xf32> to vector<4x1xf32>
    %52 = vector.broadcast %51 : vector<4x1xf32> to vector<4x640xf32>
    %53 = arith.mulf %50, %52 : vector<4x640xf32>
    %54 = arith.addf %49, %53 : vector<4x640xf32>
    %55 = vector.extract_strided_slice %0 {offsets = [0, 19], sizes = [4, 640], strides = [1, 1]} : vector<4x768xf32> to vector<4x640xf32>
    %56 = vector.extract_strided_slice %1 {offsets = [0, 9], sizes = [4, 1], strides = [1, 1]} : vector<4x16xf32> to vector<4x1xf32>
    %57 = vector.broadcast %56 : vector<4x1xf32> to vector<4x640xf32>
    %58 = arith.mulf %55, %57 : vector<4x640xf32>
    %59 = arith.addf %54, %58 : vector<4x640xf32>
    %60 = vector.extract_strided_slice %0 {offsets = [0, 36], sizes = [4, 640], strides = [1, 1]} : vector<4x768xf32> to vector<4x640xf32>
    %61 = vector.extract_strided_slice %1 {offsets = [0, 3], sizes = [4, 1], strides = [1, 1]} : vector<4x16xf32> to vector<4x1xf32>
    %62 = vector.broadcast %61 : vector<4x1xf32> to vector<4x640xf32>
    %63 = arith.mulf %60, %62 : vector<4x640xf32>
    %64 = arith.addf %59, %63 : vector<4x640xf32>
    %65 = vector.extract_strided_slice %0 {offsets = [0, 37], sizes = [4, 640], strides = [1, 1]} : vector<4x768xf32> to vector<4x640xf32>
    %66 = vector.extract_strided_slice %1 {offsets = [0, 1], sizes = [4, 1], strides = [1, 1]} : vector<4x16xf32> to vector<4x1xf32>
    %67 = vector.broadcast %66 : vector<4x1xf32> to vector<4x640xf32>
    %68 = arith.mulf %65, %67 : vector<4x640xf32>
    %69 = arith.addf %64, %68 : vector<4x640xf32>
    %70 = vector.broadcast %2 : vector<4x1xf32> to vector<4x640xf32>
    %71 = arith.addf %69, %70 : vector<4x640xf32>
    %cst_7 = arith.constant 0.000000e+00 : f32
    %72 = vector.broadcast %cst_7 : f32 to vector<4x640xf32>
    %73 = vector.extract_strided_slice %0 {offsets = [0, 19], sizes = [4, 640], strides = [1, 1]} : vector<4x768xf32> to vector<4x640xf32>
    %74 = vector.extract_strided_slice %1 {offsets = [0, 10], sizes = [4, 1], strides = [1, 1]} : vector<4x16xf32> to vector<4x1xf32>
    %75 = vector.broadcast %74 : vector<4x1xf32> to vector<4x640xf32>
    %76 = arith.mulf %73, %75 : vector<4x640xf32>
    %77 = arith.addf %72, %76 : vector<4x640xf32>
    %78 = vector.extract_strided_slice %0 {offsets = [0, 20], sizes = [4, 640], strides = [1, 1]} : vector<4x768xf32> to vector<4x640xf32>
    %79 = vector.extract_strided_slice %1 {offsets = [0, 8], sizes = [4, 1], strides = [1, 1]} : vector<4x16xf32> to vector<4x1xf32>
    %80 = vector.broadcast %79 : vector<4x1xf32> to vector<4x640xf32>
    %81 = arith.mulf %78, %80 : vector<4x640xf32>
    %82 = arith.addf %77, %81 : vector<4x640xf32>
    %83 = vector.extract_strided_slice %0 {offsets = [0, 37], sizes = [4, 640], strides = [1, 1]} : vector<4x768xf32> to vector<4x640xf32>
    %84 = vector.extract_strided_slice %1 {offsets = [0, 2], sizes = [4, 1], strides = [1, 1]} : vector<4x16xf32> to vector<4x1xf32>
    %85 = vector.broadcast %84 : vector<4x1xf32> to vector<4x640xf32>
    %86 = arith.mulf %83, %85 : vector<4x640xf32>
    %87 = arith.addf %82, %86 : vector<4x640xf32>
    %88 = vector.extract_strided_slice %0 {offsets = [0, 38], sizes = [4, 640], strides = [1, 1]} : vector<4x768xf32> to vector<4x640xf32>
    %89 = vector.extract_strided_slice %1 {offsets = [0, 0], sizes = [4, 1], strides = [1, 1]} : vector<4x16xf32> to vector<4x1xf32>
    %90 = vector.broadcast %89 : vector<4x1xf32> to vector<4x640xf32>
    %91 = arith.mulf %88, %90 : vector<4x640xf32>
    %92 = arith.addf %87, %91 : vector<4x640xf32>
    %93 = vector.broadcast %2 : vector<4x1xf32> to vector<4x640xf32>
    %94 = arith.addf %92, %93 : vector<4x640xf32>
    %95 = tpu.concatenate %25, %48, %71, %94 in 1 : vector<4x640xf32>, vector<4x640xf32>, vector<4x640xf32>, vector<4x640xf32> -> vector<4x2560xf32>
    %c0_8 = arith.constant 0 : index
    %c0_9 = arith.constant 0 : index
    %96 = vector.load %arg4[%c0_8, %c0_9] : memref<8x4xf32, #tpu.memory_space<vmem>>, vector<8x4xf32>
    %cst_10 = arith.constant dense<0.000000e+00> : vector<8x2560xf32>
    %97 = tpu.matmul %96, %95, %cst_10 {dimension_numbers = #tpu.dot_dimension_numbers<[1], [0], [0], [1], [0, 0, 1, 1], [], []>} : vector<8x4xf32>, vector<4x2560xf32>, vector<8x2560xf32> -> vector<8x2560xf32>
    %c0_11 = arith.constant 0 : index
    %c0_12 = arith.constant 0 : index
    %98 = vector.load %arg5[%c0_11, %c0_12] : memref<8x1xf32, #tpu.memory_space<vmem>>, vector<8x1xf32>
    %99 = vector.broadcast %98 : vector<8x1xf32> to vector<8x2560xf32>
    %100 = arith.addf %97, %99 : vector<8x2560xf32>
    %c0_13 = arith.constant 0 : index
    %c0_14 = arith.constant 0 : index
    %101 = vector.load %arg8[%c0_13, %c0_14] : memref<1x640xf32, #tpu.memory_space<vmem>>, vector<1x640xf32>
    %102 = tpu.concatenate %101, %101, %101, %101 in 1 : vector<1x640xf32>, vector<1x640xf32>, vector<1x640xf32>, vector<1x640xf32> -> vector<1x2560xf32>
    %103 = vector.broadcast %102 : vector<1x2560xf32> to vector<8x2560xf32>
    %104 = arith.mulf %100, %103 : vector<8x2560xf32>
    %cst_15 = arith.constant dense<0.000000e+00> : vector<8xf32>
    %105 = vector.multi_reduction <add>, %104, %cst_15 [1] : vector<8x2560xf32> to vector<8xf32>
    %106 = vector.shape_cast %105 : vector<8xf32> to vector<8x1xf32>
    %cst_16 = arith.constant 4.8828125E-4 : f32
    %107 = vector.broadcast %cst_16 : f32 to vector<8x1xf32>
    %108 = arith.mulf %106, %107 : vector<8x1xf32>
    %109 = vector.broadcast %108 : vector<8x1xf32> to vector<8x2560xf32>
    %110 = arith.subf %100, %109 : vector<8x2560xf32>
    %111 = vector.broadcast %102 : vector<1x2560xf32> to vector<8x2560xf32>
    %112 = arith.mulf %110, %111 : vector<8x2560xf32>
    %113 = arith.mulf %112, %112 : vector<8x2560xf32>
    %cst_17 = arith.constant dense<0.000000e+00> : vector<8xf32>
    %114 = vector.multi_reduction <add>, %113, %cst_17 [1] : vector<8x2560xf32> to vector<8xf32>
    %115 = vector.shape_cast %114 : vector<8xf32> to vector<8x1xf32>
    %cst_18 = arith.constant 4.8828125E-4 : f32
    %116 = vector.broadcast %cst_18 : f32 to vector<8x1xf32>
    %117 = arith.mulf %115, %116 : vector<8x1xf32>
    %cst_19 = arith.constant 9.99999974E-6 : f32
    %118 = vector.broadcast %cst_19 : f32 to vector<8x1xf32>
    %119 = arith.addf %117, %118 : vector<8x1xf32>
    %120 = math.rsqrt %119 : vector<8x1xf32>
    %c0_20 = arith.constant 0 : index
    %c0_21 = arith.constant 0 : index
    %121 = vector.load %arg6[%c0_20, %c0_21] : memref<8x1xf32, #tpu.memory_space<vmem>>, vector<8x1xf32>
    %122 = arith.mulf %121, %120 : vector<8x1xf32>
    %c0_22 = arith.constant 0 : index
    %c0_23 = arith.constant 0 : index
    %123 = vector.load %arg7[%c0_22, %c0_23] : memref<8x1xf32, #tpu.memory_space<vmem>>, vector<8x1xf32>
    %124 = arith.mulf %108, %122 : vector<8x1xf32>
    %125 = arith.subf %123, %124 : vector<8x1xf32>
    %126 = vector.broadcast %122 : vector<8x1xf32> to vector<8x2560xf32>
    %127 = arith.mulf %100, %126 : vector<8x2560xf32>
    %128 = vector.broadcast %125 : vector<8x1xf32> to vector<8x2560xf32>
    %129 = arith.addf %127, %128 : vector<8x2560xf32>
    %cst_24 = arith.constant 0.000000e+00 : f32
    %130 = vector.broadcast %cst_24 : f32 to vector<8x2560xf32>
    %131 = arith.cmpf ogt, %129, %130 : vector<8x2560xf32>
    %cst_25 = arith.constant 0.00999999977 : f32
    %132 = vector.broadcast %cst_25 : f32 to vector<8x2560xf32>
    %133 = arith.mulf %132, %129 : vector<8x2560xf32>
    %134 = arith.select %131, %129, %133 : vector<8x2560xi1>, vector<8x2560xf32>
    %c0_26 = arith.constant 0 : index
    %c0_27 = arith.constant 0 : index
    %135 = vector.load %arg9[%c0_26, %c0_27] : memref<8x2560xf32, #tpu.memory_space<vmem>>, vector<8x2560xf32>
    tpu.vector_store %arg9[%c0_26, %c0_27], %134 {strides = array<i32>} : memref<8x2560xf32, #tpu.memory_space<vmem>>, vector<8x2560xf32>,
    return
  }
  func.func @transform_0(%arg0: i32) -> (i32, i32) {
    %c0_i32 = arith.constant 0 : i32
    %c0_i32_0 = arith.constant 0 : i32
    %c0_i32_1 = arith.constant 0 : i32
    return %c0_i32, %c0_i32_0 : i32, i32
  }
  func.func @transform_1(%arg0: i32) -> (i32, i32) {
    %c0_i32 = arith.constant 0 : i32
    %c0_i32_0 = arith.constant 0 : i32
    %c0_i32_1 = arith.constant 0 : i32
    return %c0_i32, %c0_i32_0 : i32, i32
  }
  func.func @transform_2(%arg0: i32) -> (i32, i32) {
    %c0_i32 = arith.constant 0 : i32
    %c0_i32_0 = arith.constant 0 : i32
    %c0_i32_1 = arith.constant 0 : i32
    return %c0_i32, %c0_i32_0 : i32, i32
  }
  func.func @transform_3(%arg0: i32) -> (i32, i32) {
    %c0_i32 = arith.constant 0 : i32
    %c0_i32_0 = arith.constant 0 : i32
    %c0_i32_1 = arith.constant 0 : i32
    return %c0_i32, %c0_i32_0 : i32, i32
  }
  func.func @transform_4(%arg0: i32) -> (i32, i32) {
    %c0_i32 = arith.constant 0 : i32
    %c0_i32_0 = arith.constant 0 : i32
    %c0_i32_1 = arith.constant 0 : i32
    return %c0_i32, %c0_i32_0 : i32, i32
  }
  func.func @transform_5(%arg0: i32) -> (i32, i32) {
    %c0_i32 = arith.constant 0 : i32
    %c0_i32_0 = arith.constant 0 : i32
    %c0_i32_1 = arith.constant 0 : i32
    return %c0_i32, %c0_i32_0 : i32, i32
  }
  func.func @transform_6(%arg0: i32) -> (i32, i32) {
    %c0_i32 = arith.constant 0 : i32
    %c0_i32_0 = arith.constant 0 : i32
    %c0_i32_1 = arith.constant 0 : i32
    return %c0_i32, %c0_i32_0 : i32, i32
  }
  func.func @transform_7(%arg0: i32) -> (i32, i32) {
    %c0_i32 = arith.constant 0 : i32
    %c0_i32_0 = arith.constant 0 : i32
    %c0_i32_1 = arith.constant 0 : i32
    return %c0_i32, %c0_i32_0 : i32, i32
  }
  func.func @transform_8(%arg0: i32) -> (i32, i32) {
    %c0_i32 = arith.constant 0 : i32
    %c0_i32_0 = arith.constant 0 : i32
    %c0_i32_1 = arith.constant 0 : i32
    return %c0_i32, %c0_i32_0 : i32, i32
  }
}

</mosaic_0001>

<bundles_post_ra>
// kernel: squeeze.2
= control target key start
LH: loop header
LB: loop body
LE: loop exit
PB: predicated region body
PF: predicated region fallthrough
CT: control target
= control target key end

     0   :  { %vm21_vm0 = vcmask 31744   ;;  %s56_s14 = smov 4   ;;  %s57_s15 = smov 8   ;;  %vm27_vm1 = vcmask 130144   ;;  %vm33_vm2 = vcmask 97344   ;;  %vm39_vm3 = vcmask 64544   ;;  %s83_s0 = inlined_call_operand.vmem [shape: f32[4,1,4,4], index: 0, kind: input, shape index: {}]   ;;  %s84_s1 = inlined_call_operand.vmem [shape: f32[4,16], index: 1, kind: output, shape index: {}]  }
   0x1   :  { %v49_v0 = vld [vmem:[%s83_s0 + $0xc] sm:$0xf]  ;;  %v50_v1 = vld [vmem:[%s83_s0 + $0x8] sm:$0xf]  ;;  %v51_v2 = vld [vmem:[%s83_s0 + $0x4] sm:$0xf] }
   0x2   :  { %8 = vst [vmem:[#allocation1 + $0x18] sm:$0xf] %v49_v0  ;;  %13 = vst [vmem:[#allocation1 + $0x10] sm:$0xf] %v50_v1  ;;  %v18_v3 = vld [vmem:[%s83_s0] sm:$0xf] }
   0x3   :  { %17 = vst [vmem:[#allocation1 + $0x8] sm:$0xf] %v51_v2  ;;  %19 = vst [vmem:[#allocation1] sm:$0xf] %v18_v3  ;;  %s55_s0 = smov 12  }
   0xa   :  { %v24_v4 = vld [vmem:[#allocation1 + $0x3] ss:$8 sm:$0xf]   ;;  %v36_v5 = vld [vmem:[#allocation1 + $0x1] ss:$8 sm:$0xf]  }
   0xb   :  { %25 = vrot.lane.b32.xlu0 %v24_v4, %s55_s0  ;;  %v20_v6 = vld [vmem:[#allocation1] ss:$8 sm:$0xf]   ;;  %v30_v7 = vld [vmem:[#allocation1 + $0x2] ss:$8 sm:$0xf]   ;;  %37 = vrot.lane.b32.xlu1 %v36_v5, %s56_s14 }
   0xc   :  { %22 = vst.msk [vmem:[#allocation0] sm:$0xf] %vm21_vm0, %v20_v6  }
   0xf   :  { %31 = vrot.lane.b32.xlu0 %v30_v7, %s57_s15 }
  0x7d   :  { %v26_v8 = vpop.permute.xlu0 %25   ;;  %v38_v9 = vpop.permute.xlu1 %37  }
  0x7e   :  { %28 = vst.msk [vmem:[#allocation0] sm:$0xf] %vm27_vm1, %v26_v8  }
  0x81   :  { %v32_v10 = vpop.permute.xlu0 %31  }
  0x82   :  { %34 = vst.msk [vmem:[#allocation0] sm:$0xf] %vm33_vm2, %v32_v10  }
  0x83   :  { %40 = vst.msk [vmem:[#allocation0] sm:$0xf] %vm39_vm3, %v38_v9  }
  0x8a   :  { %v44_v11 = vld [vmem:[#allocation0] sm:$0xf] }
  0x8b   :  { %46 = vst [vmem:[%s84_s1] sm:$0xf] %v44_v11 }

// kernel: conv_transpose_bn_lrelu.1
= control target key start
LH: loop header
LB: loop body
LE: loop exit
PB: predicated region body
PF: predicated region fallthrough
CT: control target
= control target key end

     0   :  { %v1794_v0 = vmov 12   ;;  %v1795_v2 = vmov 4   ;;  %v1796_v3 = vmov 6   ;;  %v1797_v4 = vmov 9   ;;  %s1811_s11 = smov 127   ;;  %s1812_s14 = smov 110   ;;  %s2565_s1 = inlined_call_operand.vmem [shape: f32[4,16], index: 1, kind: input, shape index: {}]   ;;  %s2566_s2 = inlined_call_operand.vmem [shape: f32[4,1], index: 2, kind: input, shape index: {}]   ;;  %s2567_s0 = inlined_call_operand.vmem [shape: f32[4,768], index: 0, kind: input, shape index: {}]   ;;  %s2568_s4 = inlined_call_operand.vmem [shape: f32[8,1], index: 4, kind: input, shape index: {}]   ;;  %s2569_s3 = inlined_call_operand.vmem [shape: f32[8,4], index: 3, kind: input, shape index: {}]   ;;  %s2570_s7 = inlined_call_operand.vmem [shape: f32[1,640], index: 7, kind: input, shape index: {}]   ;;  %s2571_s5 = inlined_call_operand.vmem [shape: f32[8,1], index: 5, kind: input, shape index: {}]   ;;  %s2572_s6 = inlined_call_operand.vmem [shape: f32[8,1], index: 6, kind: input, shape index: {}]   ;;  %s2573_s8 = inlined_call_operand.vmem [shape: f32[8,2560], index: 8, kind: output, shape index: {}]  }
   0x1   :  { %1773 = vset.pattern.permute.xlu0 %v1794_v0  ;;  %v1863_v1 = vld [vmem:[%s2565_s1] sm:$0xf]  ;;  %1775 = vset.pattern.permute.xlu1 %v1795_v2  ;;  %v1798_v5 = vmov 3   ;;  %v1799_v6 = vmov 1   ;;  %v1800_v7 = vmov 8   ;;  %v1801_v8 = vmov 0  }
   0x2   :  { %200 = vperm.xlu0 %1773, %v1863_v1   ;;  %274 = vperm.xlu1 %1775, %v1863_v1   ;;  %v1802_v9 = vmov 2   ;;  %v1803_v10 = vmov 5   ;;  %v1804_v11 = vmov 13   ;;  %v1805_v12 = vmov 10   ;;  %v33_v15 = vld [vmem:[%s2566_s2] sm:$0xf] }
   0x3   :  { %v1806_v13 = vmov 7   ;;  %v1807_v14 = vmov 14   ;;  %v1808_v16 = vmov 11   ;;  %v1809_v17 = vmov 15   ;;  %v1894_v25 = vld [vmem:[%s2567_s0 + $0x8] sm:$0xff]  ;;  %v1899_v26 = vld [vmem:[%s2567_s0] sm:$0xff] }
   0x4   :  { %v1810_v18 = vmov 839922192   ;;  %v41_v20 = vlaneseq  ;;  %v1913_v36 = vld [vmem:[%s2567_s0 + $0x10] sm:$0xff]  ;;  %s1813_s15 = smov 109   ;;  %vm78_vm0 = vcmask 1043456   ;;  %vm80_vm1 = vcmask 1039360  }
   0x5   :  { %v39_v19 = vunpack.c.l.s4 %v1810_v18  ;;  %vm118_vm2 = vcmask 900096   ;;  %vm156_vm3 = vcmask 891904   ;;  %vm656_vm4 = vcmask 31744  }
   0x6   :  { %1774 = vset.pattern.permute.xlu0 %v1796_v3  ;;  %1776 = vset.pattern.permute.xlu1 %v1797_v4  ;;  %v1886_v22 = vshrl.u32 %v41_v20, 7 }
   0x7   :  { %237 = vperm.xlu0 %1774, %v1863_v1   ;;  %331 = vperm.xlu1 %1776, %v1863_v1   ;;  %v40_v21 = vunpack.c.0.s8 %v39_v19 }
   0x9   :  { %v1889_v23 = vsub.s32 %v40_v21, %v1886_v22 }
   0xb   :  { %1777 = vset.pattern.permute.xlu1 %v1798_v5  ;;  %1778 = vset.pattern.permute.xlu0 %v1799_v6 }
   0xc   :  { %368 = vperm.xlu1 %1777, %v1863_v1   ;;  %405 = vperm.xlu0 %1778, %v1863_v1  }
  0x10   :  { %1779 = vset.pattern.permute.xlu1 %v1800_v7  ;;  %1781 = vset.pattern.permute.xlu0 %v1801_v8 }
  0x11   :  { %462 = vperm.xlu1 %1779, %v1863_v1   ;;  %536 = vperm.xlu0 %1781, %v1863_v1  }
  0x15   :  { %1780 = vset.pattern.permute.xlu1 %v1802_v9  ;;  %1784 = vset.pattern.permute.xlu0 %v1803_v10 }
  0x16   :  { %499 = vperm.xlu1 %1780, %v1863_v1   ;;  %130 = vperm.xlu0 %1784, %v1863_v1  }
  0x1a   :  { %1782 = vset.pattern.permute.xlu1 %v1804_v11  ;;  %1788 = vset.pattern.permute.xlu0 %v1805_v12 }
  0x1b   :  { %53 = vperm.xlu1 %1782, %v1863_v1   ;;  %445 = vperm.xlu0 %1788, %v1863_v1  }
  0x1f   :  { %1783 = vset.pattern.permute.xlu1 %v1806_v13  ;;  %1789 = vset.pattern.permute.xlu0 %v1809_v17 }
  0x20   :  { %92 = vperm.xlu1 %1783, %v1863_v1  }
  0x24   :  { %1785 = vset.pattern.permute.xlu1 %v1807_v14 }
  0x25   :  { %183 = vperm.xlu1 %1785, %v1863_v1  }
  0x29   :  { %1786 = vset.pattern.permute.xlu1 %v1801_v8 }
  0x2a   :  { %169 = vperm.xlu1 %1786, %v33_v15  }
  0x2e   :  { %1787 = vset.pattern.permute.xlu1 %v1808_v16 }
  0x2f   :  { %314 = vperm.xlu1 %1787, %v1863_v1  }
  0x33   :  { %1790 = vset.pattern.permute.xlu1 %v1801_v8 }
  0x81   :  { %v201_v24 = vpop.permute.xlu0 %200  ;;  %v275_v30 = vpop.permute.xlu1 %274 }
  0x82   :  { %v208_v27 = vrot.slane %v201_v24, %v1889_v23  ;;  %v282_v33 = vrot.slane %v275_v30, %v1889_v23 }
  0x84   :  { %v211_v28 = vmul.f32 %v208_v27, %v1894_v25  ;;  %v210_v29 = vmul.f32 %v208_v27, %v1899_v26  ;;  %v284_v37 = vmul.f32 %v282_v33, %v1899_v26  ;;  %v212_v39 = vmul.f32 %v208_v27, %v1913_v36 }
  0x85   :  { %v285_v41 = vmul.f32 %v282_v33, %v1894_v25  ;;  %v286_v42 = vmul.f32 %v282_v33, %v1913_v36 }
  0x86   :  { %v238_v31 = vpop.permute.xlu0 %237  ;;  %218 = vrot.lane.b32.xlu0 %v211_v28, %s1811_s11  ;;  %216 = vrot.lane.b32.xlu1 %v210_v29, %s1811_s11  ;;  %v332_v38 = vpop.permute.xlu1 %331 }
  0x87   :  { %v245_v32 = vrot.slane %v238_v31, %v1889_v23  ;;  %v339_v40 = vrot.slane %v332_v38, %v1889_v23 }
  0x89   :  { %v247_v34 = vmul.f32 %v245_v32, %v1899_v26  ;;  %v248_v35 = vmul.f32 %v245_v32, %v1894_v25  ;;  %v342_v43 = vmul.f32 %v339_v40, %v1894_v25  ;;  %v249_v45 = vmul.f32 %v245_v32, %v1913_v36 }
  0x8a   :  { %v341_v48 = vmul.f32 %v339_v40, %v1899_v26  ;;  %v343_v49 = vmul.f32 %v339_v40, %v1913_v36 }
  0x8b   :  { %253 = vrot.lane.b32.xlu0 %v247_v34, %s1812_s14  ;;  %255 = vrot.lane.b32.xlu1 %v248_v35, %s1812_s14  ;;  %v369_v44 = vpop.permute.xlu1 %368  ;;  %v406_v47 = vpop.permute.xlu0 %405 }
  0x8c   :  { %v376_v46 = vrot.slane %v369_v44, %v1889_v23  ;;  %v413_v50 = vrot.slane %v406_v47, %v1889_v23 }
  0x8e   :  { %v379_v51 = vmul.f32 %v376_v46, %v1894_v25  ;;  %v378_v52 = vmul.f32 %v376_v46, %v1899_v26  ;;  %v415_v54 = vmul.f32 %v413_v50, %v1899_v26  ;;  %v380_v55 = vmul.f32 %v376_v46, %v1913_v36 }
  0x8f   :  { %220 = vrot.lane.b32.xlu0 %v212_v39, %s1811_s11  ;;  %290 = vrot.lane.b32.xlu1 %v284_v37, %s1813_s15  ;;  %v417_v57 = vmul.f32 %v413_v50, %v1913_v36  ;;  %v416_v58 = vmul.f32 %v413_v50, %v1894_v25 }
  0x90   :  { %v463_v53 = vpop.permute.xlu1 %462  ;;  %v537_v63 = vpop.permute.xlu0 %536 }
  0x91   :  { %v470_v56 = vrot.slane %v463_v53, %v1889_v23  ;;  %v544_v0 = vrot.slane %v537_v63, %v1889_v23 }
  0x93   :  { %292 = vrot.lane.b32.xlu0 %v285_v41, %s1813_s15  ;;  %294 = vrot.lane.b32.xlu1 %v286_v42, %s1813_s15  ;;  %v473_v61 = vmul.f32 %v470_v56, %v1894_v25  ;;  %v472_v62 = vmul.f32 %v470_v56, %v1899_v26  ;;  %v546_v4 = vmul.f32 %v544_v0, %v1899_v26 }
  0x94   :  { %v474_v6 = vmul.f32 %v470_v56, %v1913_v36  ;;  %v547_v7 = vmul.f32 %v544_v0, %v1894_v25  ;;  %v548_v13 = vmul.f32 %v544_v0, %v1913_v36 }
  0x95   :  { %v500_v59 = vpop.permute.xlu1 %499  ;;  %v131_v16 = vpop.permute.xlu0 %130 }
  0x96   :  { %v507_v60 = vrot.slane %v500_v59, %v1889_v23  ;;  %v138_v19 = vrot.slane %v131_v16, %v1889_v23 }
  0x97   :  { %257 = vrot.lane.b32.xlu0 %v249_v45, %s1812_s14  ;;  %349 = vrot.lane.b32.xlu1 %v342_v43, %s1811_s11 }
  0x98   :  { %v510_v2 = vmul.f32 %v507_v60, %v1894_v25  ;;  %v509_v3 = vmul.f32 %v507_v60, %v1899_v26  ;;  %v511_v10 = vmul.f32 %v507_v60, %v1913_v36  ;;  %v141_v20 = vmul.f32 %v138_v19, %v1894_v25 }
  0x99   :  { %v140_v21 = vmul.f32 %v138_v19, %v1899_v26  ;;  %v142_v24 = vmul.f32 %v138_v19, %v1913_v36 }
  0x9a   :  { %v54_v5 = vpop.permute.xlu1 %53  ;;  %v1994_v30 = vpop.permute.xlu0 %445 }
  0x9b   :  { %347 = vrot.lane.b32.xlu0 %v341_v48, %s1811_s11  ;;  %351 = vrot.lane.b32.xlu1 %v343_v49, %s1811_s11  ;;  %v61_v11 = vrot.slane %v54_v5, %v1889_v23  ;;  %v1814_v48 = vmov 0.0  }
  0x9c   :  { %764 = vmatprep.mubr.f32.mxu0 %v1814_v48  ;;  %835 = vmatprep.mubr.f32.mxu1 %v1814_v48 }
  0x9d   :  { %v63_v14 = vmul.f32 %v61_v11, %v1899_v26  ;;  %v64_v17 = vmul.f32 %v61_v11, %v1894_v25  ;;  %v65_v18 = vmul.f32 %v61_v11, %v1913_v36 }
  0x9f   :  { %386 = vrot.lane.b32.xlu0 %v379_v51, %s1812_s14  ;;  %384 = vrot.lane.b32.xlu1 %v378_v52, %s1812_s14  ;;  %v93_v9 = vpop.permute.xlu1 %92 }
  0xa0   :  { %v100_v12 = vrot.slane %v93_v9, %v1889_v23 }
  0xa2   :  { %v102_v15 = vmul.f32 %v100_v12, %v1899_v26 }
  0xa3   :  { %421 = vrot.lane.b32.xlu0 %v415_v54, %s1813_s15  ;;  %388 = vrot.lane.b32.xlu1 %v380_v55, %s1812_s14 }
  0xa4   :  { %v184_v27 = vpop.permute.xlu1 %183 }
  0xa5   :  { %v191_v43 = vrot.slane %v184_v27, %v1889_v23 }
  0xa7   :  { %425 = vrot.lane.b32.xlu0 %v417_v57, %s1813_s15  ;;  %423 = vrot.lane.b32.xlu1 %v416_v58, %s1813_s15  ;;  %v193_v54 = vmul.f32 %v191_v43, %v1899_v26  ;;  %v195_v55 = vmul.f32 %v191_v43, %v1913_v36  ;;  %v194_v63 = vmul.f32 %v191_v43, %v1894_v25 }
  0xa9   :  { %v170_v28 = vpop.permute.xlu1 %169 }
  0xab   :  { %480 = vrot.lane.b32.xlu0 %v473_v61, %s1811_s11  ;;  %478 = vrot.lane.b32.xlu1 %v472_v62, %s1811_s11 }
  0xae   :  { %v1992_v29 = vpop.permute.xlu1 %314 }
  0xaf   :  { %517 = vrot.lane.b32.xlu0 %v510_v2, %s1812_s14  ;;  %515 = vrot.lane.b32.xlu1 %v509_v3, %s1812_s14 }
  0xb3   :  { %552 = vrot.lane.b32.xlu0 %v546_v4, %s1813_s15  ;;  %482 = vrot.lane.b32.xlu1 %v474_v6, %s1811_s11 }
  0xb7   :  { %519 = vrot.lane.b32.xlu0 %v511_v10, %s1812_s14  ;;  %554 = vrot.lane.b32.xlu1 %v547_v7, %s1813_s15 }
  0xbb   :  { %36 = vperm.xlu0 %1789, %v1863_v1   ;;  %556 = vrot.lane.b32.xlu1 %v548_v13, %s1813_s15  ;;  %v103_v1 = vmul.f32 %v100_v12, %v1894_v25  ;;  %v2015_v13 = vrot.slane %v170_v28, %v1889_v23 }
  0xbf   :  { %69 = vrot.lane.b32.xlu1 %v63_v14, %s1811_s11  ;;  %108 = vrot.lane.b32.xlu0 %v102_v15, %s1812_s14 }
  0xc0   :  { %1791 = vset.pattern.permute.xlu0 %v1801_v8  ;;  %v104_v8 = vmul.f32 %v100_v12, %v1913_v36 }
  0xc3   :  { %71 = vrot.lane.b32.xlu1 %v64_v17, %s1811_s11  ;;  %73 = vrot.lane.b32.xlu0 %v65_v18, %s1811_s11 }
  0xc7   :  { %110 = vrot.lane.b32.xlu1 %v103_v1, %s1812_s14  ;;  %148 = vrot.lane.b32.xlu0 %v141_v20, %s1813_s15 }
  0xcb   :  { %146 = vrot.lane.b32.xlu1 %v140_v21, %s1813_s15  ;;  %150 = vrot.lane.b32.xlu0 %v142_v24, %s1813_s15 }
  0xcf   :  { %112 = vrot.lane.b32.xlu1 %v104_v8, %s1812_s14 }
  0xf8   :  { %v219_v31 = vpop.permute.xlu0 %218  ;;  %v217_v32 = vpop.permute.xlu1 %216 }
  0xf9   :  { %v223_v35 = vrot.slane %v219_v31, 4  ;;  %v222_v37 = vrot.slane %v217_v32, 4 }
  0xfb   :  { %v225_v44 = vsel %vm78_vm0, %v222_v37, %v223_v35 }
  0xfc   :  { %v226_v52 = vsel %vm80_vm1, %v217_v32, %v225_v44 }
  0xfd   :  { %v254_v33 = vpop.permute.xlu0 %253  ;;  %v256_v34 = vpop.permute.xlu1 %255  ;;  %v233_v0 = vadd.f32 %v226_v52, %v193_v54 }
  0xfe   :  { %v259_v40 = vrot.slane %v254_v33, 4  ;;  %v260_v41 = vrot.slane %v256_v34, 4 }
 0x100   :  { %v262_v49 = vsel %vm78_vm0, %v259_v40, %v260_v41 }
 0x101   :  { %v221_v38 = vpop.permute.xlu0 %220  ;;  %v291_v39 = vpop.permute.xlu1 %290  ;;  %v263_v59 = vsel %vm118_vm2, %v254_v33, %v262_v49 }
 0x102   :  { %v224_v42 = vrot.slane %v221_v38, 4  ;;  %v296_v51 = vrot.slane %v291_v39, 4  ;;  %v270_v12 = vadd.f32 %v263_v59, %v233_v0 }
 0x104   :  { %v227_v50 = vsel %vm78_vm0, %v223_v35, %v224_v42  ;;  %v229_v53 = vsel %vm80_vm1, %v221_v38, %v224_v42  ;;  %v322_v35 = vrot.slane %v1992_v29, %v1889_v23 }
 0x105   :  { %v293_v45 = vpop.permute.xlu0 %292  ;;  %v295_v46 = vpop.permute.xlu1 %294  ;;  %v228_v60 = vsel %vm80_vm1, %v219_v31, %v227_v50  ;;  %v235_v2 = vadd.f32 %v229_v53, %v195_v55 }
 0x106   :  { %v297_v47 = vrot.slane %v293_v45, 4  ;;  %v298_v61 = vrot.slane %v295_v46, 4  ;;  %v234_v6 = vadd.f32 %v228_v60, %v194_v63 }
 0x108   :  { %v299_v56 = vsel %vm78_vm0, %v296_v51, %v297_v47  ;;  %v303_v14 = vsel %vm156_vm3, %v295_v46, %v298_v61  ;;  %v301_v15 = vsel %vm78_vm0, %v297_v47, %v298_v61  ;;  %v325_v46 = vmul.f32 %v322_v35, %v1894_v25 }
 0x109   :  { %v258_v57 = vpop.permute.xlu0 %257  ;;  %v350_v58 = vpop.permute.xlu1 %349  ;;  %v300_v5 = vsel %vm156_vm3, %v291_v39, %v299_v56  ;;  %v302_v32 = vsel %vm156_vm3, %v293_v45, %v301_v15  ;;  %v324_v47 = vmul.f32 %v322_v35, %v1899_v26 }
 0x10a   :  { %v261_v62 = vrot.slane %v258_v57, 4  ;;  %v307_v17 = vadd.f32 %v300_v5, %v270_v12  ;;  %v354_v8 = vrot.slane %v350_v58, 4 }
 0x10c   :  { %v264_v3 = vsel %vm78_vm0, %v260_v41, %v261_v62  ;;  %v266_v4 = vsel %vm118_vm2, %v258_v57, %v261_v62  ;;  %v310_v33 = vadd.f32 %v307_v17, %v2015_v13 }
 0x10d   :  { %v265_v7 = vsel %vm118_vm2, %v256_v34, %v264_v3  ;;  %v272_v9 = vadd.f32 %v266_v4, %v235_v2  ;;  %v348_v10 = vpop.permute.xlu0 %347  ;;  %v352_v11 = vpop.permute.xlu1 %351  ;;  %v326_v2 = vmul.f32 %v322_v35, %v1913_v36 }
 0x10e   :  { %v271_v18 = vadd.f32 %v265_v7, %v234_v6  ;;  %v353_v19 = vrot.slane %v348_v10, 4  ;;  %v355_v1 = vrot.slane %v352_v11, 4  ;;  %v583_v45 = vcombine.high %v310_v33, %v310_v33 }
 0x10f   :  { %v309_v16 = vadd.f32 %v303_v14, %v272_v9 }
 0x110   :  { %v308_v34 = vadd.f32 %v302_v32, %v271_v18  ;;  %v356_v37 = vsel %vm78_vm0, %v353_v19, %v354_v8  ;;  %v358_v38 = vsel %vm78_vm0, %v354_v8, %v355_v1  ;;  %v360_v59 = vsel %vm80_vm1, %v352_v11, %v355_v1 }
 0x111   :  { %v387_v20 = vpop.permute.xlu0 %386  ;;  %v385_v21 = vpop.permute.xlu1 %384  ;;  %v312_v24 = vadd.f32 %v309_v16, %v2015_v13  ;;  %v357_v43 = vsel %vm80_vm1, %v348_v10, %v356_v37  ;;  %v359_v44 = vsel %vm80_vm1, %v350_v58, %v358_v38  ;;  %v366_v10 = vadd.f32 %v360_v59, %v326_v2 }
 0x112   :  { %v391_v27 = vrot.slane %v387_v20, 4  ;;  %v390_v31 = vrot.slane %v385_v21, 4  ;;  %v311_v29 = vadd.f32 %v308_v34, %v2015_v13  ;;  %v364_v55 = vadd.f32 %v357_v43, %v324_v47 }
 0x113   :  { %594 = vrot.lane.b32.xlu1 %v312_v24, %s1811_s11  ;;  %v585_v28 = vcombine.high %v312_v24, %v312_v24  ;;  %v365_v57 = vadd.f32 %v359_v44, %v325_v46  ;;  %v453_v24 = vrot.slane %v1994_v30, %v1889_v23 }
 0x114   :  { %v393_v41 = vsel %vm78_vm0, %v390_v31, %v391_v27  ;;  %v584_v60 = vcombine.high %v311_v29, %v311_v29 }
 0x115   :  { %v422_v39 = vpop.permute.xlu0 %421  ;;  %v389_v40 = vpop.permute.xlu1 %388  ;;  %596 = vrot.lane.b32.xlu0 %v585_v28, %s1811_s11  ;;  %v394_v51 = vsel %vm118_vm2, %v385_v21, %v393_v41  ;;  %v455_v37 = vmul.f32 %v453_v24, %v1899_v26  ;;  %v456_v46 = vmul.f32 %v453_v24, %v1894_v25 }
 0x116   :  { %v392_v42 = vrot.slane %v389_v40, 4  ;;  %v427_v49 = vrot.slane %v422_v39, 4  ;;  %v401_v61 = vadd.f32 %v394_v51, %v364_v55 }
 0x117   :  { %586 = vrot.lane.b32.xlu1 %v310_v33, %s1811_s11 }
 0x118   :  { %v395_v50 = vsel %vm78_vm0, %v391_v27, %v392_v42  ;;  %v397_v11 = vsel %vm118_vm2, %v389_v40, %v392_v42 }
 0x119   :  { %v426_v52 = vpop.permute.xlu0 %425  ;;  %v396_v53 = vsel %vm118_vm2, %v387_v20, %v395_v50  ;;  %v424_v54 = vpop.permute.xlu1 %423  ;;  %588 = vrot.lane.b32.xlu0 %v583_v45, %s1811_s11  ;;  %v403_v1 = vadd.f32 %v397_v11, %v366_v10 }
 0x11a   :  { %v429_v56 = vrot.slane %v426_v52, 4  ;;  %v428_v58 = vrot.slane %v424_v54, 4  ;;  %v402_v62 = vadd.f32 %v396_v53, %v365_v57 }
 0x11b   :  { %590 = vrot.lane.b32.xlu1 %v311_v29, %s1811_s11 }
 0x11c   :  { %v430_v63 = vsel %vm78_vm0, %v427_v49, %v428_v58  ;;  %v432_v0 = vsel %vm78_vm0, %v428_v58, %v429_v56  ;;  %v434_v17 = vsel %vm156_vm3, %v426_v52, %v429_v56  ;;  %v457_v58 = vmul.f32 %v453_v24, %v1913_v36 }
 0x11d   :  { %v433_v3 = vsel %vm156_vm3, %v424_v54, %v432_v0  ;;  %v481_v4 = vpop.permute.xlu0 %480  ;;  %v479_v5 = vpop.permute.xlu1 %478  ;;  %592 = vrot.lane.b32.xlu0 %v584_v60, %s1811_s11  ;;  %v431_v6 = vsel %vm156_vm3, %v422_v39, %v430_v63  ;;  %v440_v8 = vadd.f32 %v434_v17, %v403_v1 }
 0x11e   :  { %v439_v7 = vadd.f32 %v433_v3, %v402_v62  ;;  %v438_v9 = vadd.f32 %v431_v6, %v401_v61  ;;  %v485_v12 = vrot.slane %v481_v4, 4  ;;  %v484_v14 = vrot.slane %v479_v5, 4 }
 0x11f   :  { %v443_v30 = vadd.f32 %v440_v8, %v2015_v13  ;;  %v650_v8 = vld [vmem:[%s2568_s4] sm:$0xff] }
 0x120   :  { %v442_v15 = vadd.f32 %v439_v7, %v2015_v13  ;;  %v441_v16 = vadd.f32 %v438_v9, %v2015_v13  ;;  %v487_v27 = vsel %vm78_vm0, %v484_v14, %v485_v12 }
 0x121   :  { %v518_v18 = vpop.permute.xlu0 %517  ;;  %v516_v19 = vpop.permute.xlu1 %515  ;;  %v488_v35 = vsel %vm80_vm1, %v479_v5, %v487_v27 }
 0x122   :  { %v522_v20 = vrot.slane %v518_v18, 4  ;;  %v521_v21 = vrot.slane %v516_v19, 4  ;;  %613 = vrot.lane.b32.xlu0 %v442_v15, %s1812_s14  ;;  %609 = vrot.lane.b32.xlu1 %v441_v16, %s1812_s14  ;;  %v606_v31 = vcombine.high %v441_v16, %v441_v16  ;;  %v495_v43 = vadd.f32 %v488_v35, %v455_v37 }
 0x123   :  { %v607_v7 = vcombine.high %v442_v15, %v442_v15 }
 0x124   :  { %v524_v33 = vsel %vm78_vm0, %v521_v21, %v522_v20 }
 0x125   :  { %v553_v32 = vpop.permute.xlu0 %552  ;;  %v483_v28 = vpop.permute.xlu1 %482  ;;  %v525_v40 = vsel %vm118_vm2, %v516_v19, %v524_v33 }
 0x126   :  { %v486_v34 = vrot.slane %v483_v28, 4  ;;  %611 = vrot.lane.b32.xlu1 %v606_v31, %s1812_s14  ;;  %v558_v38 = vrot.slane %v553_v32, 4  ;;  %v532_v47 = vadd.f32 %v525_v40, %v495_v43 }
 0x128   :  { %v489_v39 = vsel %vm78_vm0, %v485_v12, %v486_v34  ;;  %v491_v57 = vsel %vm80_vm1, %v483_v28, %v486_v34  ;;  %v608_v12 = vcombine.high %v443_v30, %v443_v30 }
 0x129   :  { %v520_v41 = vpop.permute.xlu0 %519  ;;  %v555_v42 = vpop.permute.xlu1 %554  ;;  %v490_v29 = vsel %vm80_vm1, %v481_v4, %v489_v39  ;;  %v497_v2 = vadd.f32 %v491_v57, %v457_v58 }
 0x12a   :  { %v523_v44 = vrot.slane %v520_v41, 4  ;;  %v559_v45 = vrot.slane %v555_v42, 4  ;;  %617 = vrot.lane.b32.xlu1 %v443_v30, %s1812_s14  ;;  %v496_v54 = vadd.f32 %v490_v29, %v456_v46 }
 0x12c   :  { %v526_v49 = vsel %vm78_vm0, %v522_v20, %v523_v44  ;;  %v561_v50 = vsel %vm78_vm0, %v558_v38, %v559_v45  ;;  %v528_v62 = vsel %vm118_vm2, %v520_v41, %v523_v44 }
 0x12d   :  { %v527_v51 = vsel %vm118_vm2, %v518_v18, %v526_v49  ;;  %v557_v52 = vpop.permute.xlu1 %556  ;;  %v562_v53 = vsel %vm156_vm3, %v553_v32, %v561_v50  ;;  %v534_v6 = vadd.f32 %v528_v62, %v497_v2 }
 0x12e   :  { %v560_v55 = vrot.slane %v557_v52, 4  ;;  %v569_v56 = vadd.f32 %v562_v53, %v532_v47  ;;  %v533_v61 = vadd.f32 %v527_v51, %v496_v54 }
 0x130   :  { %v563_v59 = vsel %vm78_vm0, %v559_v45, %v560_v55  ;;  %v572_v60 = vadd.f32 %v569_v56, %v2015_v13  ;;  %v565_v5 = vsel %vm156_vm3, %v557_v52, %v560_v55 }
 0x131   :  { %v564_v63 = vsel %vm156_vm3, %v555_v42, %v563_v59  ;;  %v70_v0 = vpop.permute.xlu1 %69  ;;  %v571_v10 = vadd.f32 %v565_v5, %v534_v6 }
 0x132   :  { %632 = vrot.lane.b32.xlu0 %v572_v60, %s1813_s15  ;;  %v629_v3 = vcombine.high %v572_v60, %v572_v60  ;;  %v570_v4 = vadd.f32 %v564_v63, %v533_v61  ;;  %v75_v14 = vrot.slane %v70_v0, 4  ;;  %v2111_v61 = vld [vmem:[%s2569_s3] sm:$0xff] }
 0x133   :  { %v574_v19 = vadd.f32 %v571_v10, %v2015_v13 }
 0x134   :  { %634 = vrot.lane.b32.xlu1 %v629_v3, %s1813_s15  ;;  %v573_v11 = vadd.f32 %v570_v4, %v2015_v13 }
 0x135   :  { %v72_v9 = vpop.permute.xlu1 %71 }
 0x136   :  { %615 = vrot.lane.b32.xlu0 %v607_v7, %s1812_s14  ;;  %v76_v16 = vrot.slane %v72_v9, 4  ;;  %v630_v15 = vcombine.high %v573_v11, %v573_v11 }
 0x138   :  { %636 = vrot.lane.b32.xlu1 %v573_v11, %s1813_s15  ;;  %v79_v20 = vsel %vm78_vm0, %v75_v14, %v76_v16 }
 0x139   :  { %v111_v17 = vpop.permute.xlu1 %110  ;;  %v81_v28 = vsel %vm80_vm1, %v70_v0, %v79_v20 }
 0x13a   :  { %v37_v18 = vpop.permute.xlu0 %36  ;;  %619 = vrot.lane.b32.xlu0 %v608_v12, %s1812_s14  ;;  %v115_v21 = vrot.slane %v111_v17, 4 }
 0x13b   :  { %v44_v1 = vrot.slane %v37_v18, %v1889_v23  ;;  %v631_v23 = vcombine.high %v574_v19, %v574_v19 }
 0x13c   :  { %640 = vrot.lane.b32.xlu1 %v574_v19, %s1813_s15 }
 0x13d   :  { %v147_v24 = vpop.permute.xlu1 %146  ;;  %v46_v31 = vmul.f32 %v44_v1, %v1899_v26  ;;  %v48_v35 = vmul.f32 %v44_v1, %v1913_v36  ;;  %v47_v39 = vmul.f32 %v44_v1, %v1894_v25 }
 0x13e   :  { %638 = vrot.lane.b32.xlu0 %v630_v15, %s1813_s15  ;;  %v109_v27 = vpop.permute.xlu0 %108  ;;  %v152_v43 = vrot.slane %v147_v24, 4 }
 0x13f   :  { %v114_v32 = vrot.slane %v109_v27, 4  ;;  %v88_v40 = vadd.f32 %v81_v28, %v46_v31 }
 0x140   :  { %653 = vperm.xlu1 %1790, %v650_v8  }
 0x141   :  { %v117_v33 = vsel %vm78_vm0, %v114_v32, %v115_v21  ;;  %v113_v34 = vpop.permute.xlu1 %112 }
 0x142   :  { %642 = vrot.lane.b32.xlu0 %v631_v23, %s1813_s15  ;;  %v74_v37 = vpop.permute.xlu0 %73  ;;  %v116_v38 = vrot.slane %v113_v34, 4  ;;  %v119_v26 = vsel %vm118_vm2, %v109_v27, %v117_v33 }
 0x143   :  { %v77_v30 = vrot.slane %v74_v37, 4  ;;  %v126_v47 = vadd.f32 %v119_v26, %v88_v40 }
 0x144   :  { %v120_v44 = vsel %vm78_vm0, %v115_v21, %v116_v38  ;;  %v122_v0 = vsel %vm118_vm2, %v113_v34, %v116_v38 }
 0x145   :  { %v82_v41 = vsel %vm78_vm0, %v76_v16, %v77_v30  ;;  %v84_v42 = vsel %vm80_vm1, %v74_v37, %v77_v30  ;;  %v121_v25 = vsel %vm118_vm2, %v111_v17, %v120_v44 }
 0x146   :  { %v83_v45 = vsel %vm80_vm1, %v72_v9, %v82_v41  ;;  %v90_v29 = vadd.f32 %v84_v42, %v48_v35  ;;  %v149_v46 = vpop.permute.xlu0 %148 }
 0x147   :  { %v153_v36 = vrot.slane %v149_v46, 4  ;;  %v89_v49 = vadd.f32 %v83_v45, %v47_v39  ;;  %v1414_v45 = vsub.s32 0, %v1886_v22 }
 0x148   :  { %v128_v2 = vadd.f32 %v122_v0, %v90_v29  ;;  %v1410_v29 = vld [vmem:[%s2570_s7] sm:$0x1f] }
 0x149   :  { %v155_v50 = vsel %vm78_vm0, %v152_v43, %v153_v36  ;;  %v127_v55 = vadd.f32 %v121_v25, %v89_v49 }
 0x14a   :  { %v151_v51 = vpop.permute.xlu0 %150  ;;  %v157_v52 = vsel %vm156_vm3, %v147_v24, %v155_v50 }
 0x14b   :  { %v154_v53 = vrot.slane %v151_v51, 4  ;;  %v164_v54 = vadd.f32 %v157_v52, %v126_v47  ;;  %v1422_v47 = vsub.s32 2, %v1886_v22 }
 0x14d   :  { %v158_v56 = vsel %vm78_vm0, %v153_v36, %v154_v53  ;;  %v179_v57 = vadd.f32 %v2015_v13, %v164_v54  ;;  %v160_v3 = vsel %vm156_vm3, %v151_v51, %v154_v53  ;;  %v1415_v36 = vrot.slane %v1410_v29, %v1414_v45 }
 0x14e   :  { %v159_v58 = vsel %vm156_vm3, %v149_v46, %v158_v56  ;;  %v166_v6 = vadd.f32 %v160_v3, %v128_v2  ;;  %v1418_v46 = vsub.s32 1, %v1886_v22  ;;  %v1423_v50 = vrot.slane %v1410_v29, %v1422_v47 }
 0x14f   :  { %v578_v59 = vcombine.high %v179_v57, %v179_v57  ;;  %v165_v60 = vadd.f32 %v159_v58, %v127_v55  ;;  %v2188_v51 = vrot.slane %v1415_v36, %v1414_v45  ;;  %v1426_v55 = vsub.s32 3, %v1886_v22 }
 0x150   :  { %v181_v10 = vadd.f32 %v2015_v13, %v166_v6  ;;  %v1419_v49 = vrot.slane %v1410_v29, %v1418_v46  ;;  %v2199_v56 = vrot.slane %v1423_v50, %v1414_v45 }
 0x151   :  { %1722 = vmatprep.subr.msk.mxu0 %vm78_vm0, %v578_v59  ;;  %v180_v62 = vadd.f32 %v2015_v13, %v165_v60  ;;  %v1427_v60 = vrot.slane %v1410_v29, %v1426_v55 }
 0x152   :  { %1723 = vmatpush1.msk.msra.mxu0 %vm78_vm0, %v179_v57  ;;  %v2196_v54 = vrot.slane %v1419_v49, %v1414_v45 }
 0x153   :  { %v579_v63 = vcombine.high %v180_v62, %v180_v62  ;;  %1724 = vmatmul.mubr.msk.f32.vlgmr.msra.gmra.mrb[0].mxu0 %vm656_vm4, %v2111_v61  ;;  %v2214_v2 = vrot.slane %v1427_v60, %v1414_v45 }
 0x154   :  { %906 = vmatprep.mubr.f32.mxu0 %v1814_v48 }
 0x155   :  { %1725 = vmatprep.subr.msk.mxu1 %vm78_vm0, %v579_v63 }
 0x156   :  { %1726 = vmatpush1.msk.msra.mxu1 %vm78_vm0, %v180_v62 }
 0x157   :  { %1727 = vmatmul.mubr.msk.f32.vlgmr.msra.gmra.mrb[0].mxu1 %vm656_vm4, %v2111_v61 }
 0x158   :  { %977 = vmatprep.mubr.f32.mxu1 %v1814_v48 }
 0x185   :  { %v595_v4 = vpop.permute.xlu1 %594 }
 0x187   :  { %v597_v5 = vpop.permute.xlu0 %596 }
 0x188   :  { %v602_v12 = vsel %vm80_vm1, %v595_v4, %v597_v5 }
 0x189   :  { %v587_v7 = vpop.permute.xlu1 %586 }
 0x18b   :  { %v589_v9 = vpop.permute.xlu0 %588 }
 0x18c   :  { %v598_v11 = vsel %vm80_vm1, %v587_v7, %v589_v9 }
 0x18d   :  { %1728 = vmatprep.subr.msk.mxu0 %vm78_vm0, %v598_v11  ;;  %v591_v14 = vpop.permute.xlu1 %590 }
 0x18e   :  { %1729 = vmatpush1.msk.msra.mxu0 %vm78_vm0, %v181_v10  ;;  %v599_v13 = vsel %vm80_vm1, %v589_v9, %v591_v14 }
 0x18f   :  { %v593_v16 = vpop.permute.xlu0 %592  ;;  %1730 = vmatmul.mubr.msk.f32.vlgmr.msra.gmra.mrb[2].mxu0 %vm656_vm4, %v2111_v61  ;;  %1734 = vmatprep.subr.msk.mxu0 %vm78_vm0, %v602_v12 }
 0x190   :  { %v600_v17 = vsel %vm80_vm1, %v591_v14, %v593_v16  ;;  %v601_v18 = vsel %vm80_vm1, %v593_v16, %v595_v4  ;;  %1048 = vmatprep.mubr.f32.mxu0 %v1814_v48 }
 0x191   :  { %1731 = vmatprep.subr.msk.mxu1 %vm78_vm0, %v600_v17  ;;  %1735 = vmatpush1.msk.msra.mxu0 %vm78_vm0, %v601_v18 }
 0x192   :  { %1732 = vmatpush1.msk.msra.mxu1 %vm78_vm0, %v599_v13 }
 0x193   :  { %1733 = vmatmul.mubr.msk.f32.vlgmr.msra.gmra.mrb[2].mxu1 %vm656_vm4, %v2111_v61  ;;  %1736 = vmatmul.mubr.msk.f32.vlgmr.msra.gmra.mrb[4].mxu0 %vm656_vm4, %v2111_v61 }
 0x194   :  { %v610_v19 = vpop.permute.xlu1 %609  ;;  %1119 = vmatprep.mubr.f32.mxu1 %v1814_v48  ;;  %1190 = vmatprep.mubr.f32.mxu0 %v1814_v48  ;;  %v614_v1 = vpop.permute.xlu0 %613 }
 0x198   :  { %v612_v15 = vpop.permute.xlu1 %611 }
 0x199   :  { %v621_v20 = vsel %vm118_vm2, %v610_v19, %v612_v15  ;;  %v622_v21 = vsel %vm118_vm2, %v612_v15, %v614_v1 }
 0x19a   :  { %1737 = vmatprep.subr.msk.mxu1 %vm78_vm0, %v622_v21 }
 0x19b   :  { %1738 = vmatpush1.msk.msra.mxu1 %vm78_vm0, %v621_v20 }
 0x19c   :  { %1739 = vmatmul.mubr.msk.f32.vlgmr.msra.gmra.mrb[4].mxu1 %vm656_vm4, %v2111_v61  ;;  %v618_v24 = vpop.permute.xlu1 %617 }
 0x19d   :  { %1261 = vmatprep.mubr.f32.mxu1 %v1814_v48 }
 0x1a4   :  { %v633_v8 = vpop.permute.xlu0 %632 }
 0x1a6   :  { %v635_v27 = vpop.permute.xlu1 %634 }
 0x1a7   :  { %v644_v31 = vsel %vm156_vm3, %v633_v8, %v635_v27 }
 0x1a8   :  { %v616_v32 = vpop.permute.xlu0 %615  ;;  %1743 = vmatprep.subr.msk.mxu1 %vm78_vm0, %v644_v31 }
 0x1a9   :  { %v623_v28 = vsel %vm118_vm2, %v614_v1, %v616_v32  ;;  %v624_v23 = vsel %vm118_vm2, %v616_v32, %v618_v24 }
 0x1aa   :  { %1740 = vmatprep.subr.msk.mxu0 %vm78_vm0, %v624_v23  ;;  %v637_v35 = vpop.permute.xlu1 %636 }
 0x1ab   :  { %1741 = vmatpush1.msk.msra.mxu0 %vm78_vm0, %v623_v28  ;;  %v645_v39 = vsel %vm156_vm3, %v635_v27, %v637_v35 }
 0x1ac   :  { %v620_v33 = vpop.permute.xlu0 %619  ;;  %1742 = vmatmul.mubr.msk.f32.vlgmr.msra.gmra.mrb[6].mxu0 %vm656_vm4, %v2111_v61 }
 0x1ad   :  { %v625_v34 = vsel %vm118_vm2, %v618_v24, %v620_v33  ;;  %1332 = vmatprep.mubr.f32.mxu0 %v1814_v48 }
 0x1ae   :  { %1744 = vmatpush1.msk.msra.mxu1 %vm78_vm0, %v625_v34  ;;  %v641_v30 = vpop.permute.xlu1 %640 }
 0x1af   :  { %1745 = vmatmul.mubr.msk.f32.vlgmr.msra.gmra.mrb[6].mxu1 %vm656_vm4, %v2111_v61 }
 0x1b0   :  { %v639_v37 = vpop.permute.xlu0 %638  ;;  %1403 = vmatprep.mubr.f32.mxu1 %v1814_v48 }
 0x1b1   :  { %v646_v38 = vsel %vm156_vm3, %v637_v35, %v639_v37  ;;  %v647_v41 = vsel %vm156_vm3, %v639_v37, %v641_v30 }
 0x1b2   :  { %1746 = vmatprep.subr.msk.mxu0 %vm78_vm0, %v646_v38 }
 0x1b3   :  { %1747 = vmatpush1.msk.msra.mxu0 %vm78_vm0, %v645_v39 }
 0x1b4   :  { %v643_v40 = vpop.permute.xlu0 %642  ;;  %1748 = vmatmul.mubr.msk.f32.vlgmr.msra.gmra.mrb[8].mxu0 %vm656_vm4, %v2111_v61 }
 0x1b5   :  { %v648_v26 = vsel %vm156_vm3, %v641_v30, %v643_v40 }
 0x1b6   :  { %1749 = vmatprep.subr.msk.mxu1 %vm78_vm0, %v648_v26 }
 0x1b7   :  { %1750 = vmatpush1.msk.msra.mxu1 %vm78_vm0, %v647_v41 }
 0x1b8   :  { %1751 = vmatmul.mubr.msk.f32.vlgmr.msra.gmra.mrb[8].mxu1 %vm656_vm4, %v2111_v61  ;;  %v1430_v61 = vsub.s32 4, %v1886_v22 }
 0x1ba   :  { %v1431_v3 = vrot.slane %v1410_v29, %v1430_v61 }
 0x1bc   :  { %v2218_v6 = vrot.slane %v1431_v3, %v1414_v45 }
 0x1bf   :  { %v2186_v25 = vpop.permute.xlu1 %653 }
 0x226   :  { %v766_v48 = vpop.f32.mrb[0].mxu0 }
 0x227   :  { %v768_v42 = vpop.f32.mrb[1].mxu0  ;;  %v2191_v52 = vadd.f32 %v766_v48, %v2186_v25 }
 0x228   :  { %v2194_v53 = vadd.f32 %v768_v42, %v2186_v25 }
 0x229   :  { %v1457_v58 = vmul.f32 %v2188_v51, %v2191_v52 }
 0x22a   :  { %v837_v43 = vpop.f32.mrb[0].mxu1  ;;  %v1458_v59 = vmul.f32 %v2196_v54, %v2194_v53 }
 0x22b   :  { %v839_v44 = vpop.f32.mrb[1].mxu1  ;;  %v2202_v57 = vadd.f32 %v837_v43, %v2186_v25 }
 0x22c   :  { %v1477_v63 = vadd.f32 %v1458_v59, %v1457_v58  ;;  %v2212_v0 = vadd.f32 %v839_v44, %v2186_v25 }
 0x22d   :  { %v1459_v62 = vmul.f32 %v2199_v56, %v2202_v57 }
 0x22e   :  { %v1460_v5 = vmul.f32 %v2214_v2, %v2212_v0 }
 0x22f   :  { %v1478_v4 = vadd.f32 %v1477_v63, %v1459_v62 }
 0x231   :  { %v1479_v9 = vadd.f32 %v1478_v4, %v1460_v5 }
 0x262   :  { %v908_v7 = vpop.f32.mrb[2].mxu0 }
 0x263   :  { %v2221_v22 = vadd.f32 %v908_v7, %v2186_v25  ;;  %v910_v10 = vpop.f32.mrb[3].mxu0 }
 0x264   :  { %v2224_v11 = vadd.f32 %v910_v10, %v2186_v25 }
 0x265   :  { %v1461_v12 = vmul.f32 %v2218_v6, %v2221_v22 }
 0x266   :  { %v1462_v14 = vmul.f32 %v2188_v51, %v2224_v11  ;;  %v979_v16 = vpop.f32.mrb[2].mxu1  ;;  %v1050_v17 = vpop.f32.mrb[4].mxu0 }
 0x267   :  { %v1480_v18 = vadd.f32 %v1479_v9, %v1461_v12  ;;  %v2231_v13 = vadd.f32 %v979_v16, %v2186_v25  ;;  %v981_v19 = vpop.f32.mrb[3].mxu1  ;;  %v1052_v1 = vpop.f32.mrb[5].mxu0  ;;  %v2241_v27 = vadd.f32 %v1050_v17, %v2186_v25 }
 0x268   :  { %v2236_v21 = vadd.f32 %v981_v19, %v2186_v25  ;;  %v2246_v33 = vadd.f32 %v1052_v1, %v2186_v25 }
 0x269   :  { %v1481_v15 = vadd.f32 %v1480_v18, %v1462_v14  ;;  %v1463_v20 = vmul.f32 %v2196_v54, %v2231_v13  ;;  %v1465_v23 = vmul.f32 %v2214_v2, %v2241_v27 }
 0x26a   :  { %v1464_v8 = vmul.f32 %v2199_v56, %v2236_v21  ;;  %v1466_v37 = vmul.f32 %v2218_v6, %v2246_v33 }
 0x26b   :  { %v1482_v24 = vadd.f32 %v1481_v15, %v1463_v20 }
 0x26d   :  { %v1483_v28 = vadd.f32 %v1482_v24, %v1464_v8 }
 0x26f   :  { %v1121_v31 = vpop.f32.mrb[4].mxu1  ;;  %v1484_v34 = vadd.f32 %v1483_v28, %v1465_v23 }
 0x270   :  { %v1123_v32 = vpop.f32.mrb[5].mxu1  ;;  %v2249_v35 = vadd.f32 %v1121_v31, %v2186_v25 }
 0x271   :  { %v1485_v38 = vadd.f32 %v1484_v34, %v1466_v37  ;;  %v2256_v30 = vadd.f32 %v1123_v32, %v2186_v25 }
 0x272   :  { %v1467_v39 = vmul.f32 %v2188_v51, %v2249_v35 }
 0x273   :  { %v1468_v26 = vmul.f32 %v2196_v54, %v2256_v30 }
 0x274   :  { %v1486_v40 = vadd.f32 %v1485_v38, %v1467_v39 }
 0x276   :  { %v1487_v44 = vadd.f32 %v1486_v40, %v1468_v26 }
 0x27f   :  { %v1192_v41 = vpop.f32.mrb[6].mxu0 }
 0x280   :  { %v2261_v48 = vadd.f32 %v1192_v41, %v2186_v25  ;;  %v1194_v42 = vpop.f32.mrb[7].mxu0 }
 0x281   :  { %v2264_v43 = vadd.f32 %v1194_v42, %v2186_v25 }
 0x282   :  { %v1469_v45 = vmul.f32 %v2199_v56, %v2261_v48  ;;  %v1263_v29 = vpop.f32.mrb[6].mxu1 }
 0x283   :  { %v1470_v46 = vmul.f32 %v2214_v2, %v2264_v43  ;;  %v2271_v36 = vadd.f32 %v1263_v29, %v2186_v25  ;;  %v1265_v47 = vpop.f32.mrb[7].mxu1 }
 0x284   :  { %v1488_v49 = vadd.f32 %v1487_v44, %v1469_v45  ;;  %v2274_v50 = vadd.f32 %v1265_v47, %v2186_v25 }
 0x285   :  { %v1471_v55 = vmul.f32 %v2218_v6, %v2271_v36 }
 0x286   :  { %v1489_v58 = vadd.f32 %v1488_v49, %v1470_v46  ;;  %v1472_v61 = vmul.f32 %v2188_v51, %v2274_v50 }
 0x287   :  { %v1334_v59 = vpop.f32.mrb[8].mxu0 }
 0x288   :  { %v1490_v60 = vadd.f32 %v1489_v58, %v1471_v55  ;;  %v2281_v62 = vadd.f32 %v1334_v59, %v2186_v25  ;;  %v1336_v63 = vpop.f32.mrb[9].mxu0 }
 0x289   :  { %v2284_v3 = vadd.f32 %v1336_v63, %v2186_v25 }
 0x28a   :  { %v1491_v4 = vadd.f32 %v1490_v60, %v1472_v61  ;;  %v1473_v5 = vmul.f32 %v2196_v54, %v2281_v62 }
 0x28b   :  { %v1474_v7 = vmul.f32 %v2199_v56, %v2284_v3  ;;  %v1405_v9 = vpop.f32.mrb[8].mxu1 }
 0x28c   :  { %v1492_v10 = vadd.f32 %v1491_v4, %v1473_v5  ;;  %v2291_v12 = vadd.f32 %v1405_v9, %v2186_v25  ;;  %v1407_v14 = vpop.f32.mrb[9].mxu1 }
 0x28d   :  { %v2294_v16 = vadd.f32 %v1407_v14, %v2186_v25 }
 0x28e   :  { %v1475_v17 = vmul.f32 %v2214_v2, %v2291_v12  ;;  %v1493_v18 = vadd.f32 %v1492_v10, %v1474_v7 }
 0x28f   :  { %v1476_v19 = vmul.f32 %v2218_v6, %v2294_v16 }
 0x290   :  { %v1494_v1 = vadd.f32 %v1493_v18, %v1475_v17 }
 0x292   :  { %v1495_v15 = vadd.f32 %v1494_v1, %v1476_v19 }
 0x294   :  { %1496 = vadd.xlane.f32.xlu0 %v1495_v15 }
 0x321   :  { %v1497_v20 = vpop.xlane.xlu0 %1496 }
 0x322   :  { %v2300_v24 = vmul.f32 0.00048828125, %v1497_v20 }
 0x324   :  { %v1499_v8 = vsub.f32 %v2191_v52, %v2300_v24  ;;  %v1500_v25 = vsub.f32 %v2194_v53, %v2300_v24  ;;  %v1501_v31 = vsub.f32 %v2202_v57, %v2300_v24  ;;  %v1502_v23 = vsub.f32 %v2212_v0, %v2300_v24 }
 0x325   :  { %v1503_v34 = vsub.f32 %v2221_v22, %v2300_v24  ;;  %v1504_v40 = vsub.f32 %v2224_v11, %v2300_v24  ;;  %v1505_v41 = vsub.f32 %v2231_v13, %v2300_v24  ;;  %v1506_v29 = vsub.f32 %v2236_v21, %v2300_v24 }
 0x326   :  { %v1519_v32 = vmul.f32 %v1499_v8, %v2188_v51  ;;  %v1520_v28 = vmul.f32 %v1500_v25, %v2196_v54  ;;  %v1521_v37 = vmul.f32 %v1501_v31, %v2199_v56  ;;  %v1522_v26 = vmul.f32 %v1502_v23, %v2214_v2 }
 0x327   :  { %v1523_v42 = vmul.f32 %v1503_v34, %v2218_v6  ;;  %v1524_v46 = vmul.f32 %v1504_v40, %v2188_v51  ;;  %v1507_v55 = vsub.f32 %v2241_v27, %v2300_v24  ;;  %v1525_v58 = vmul.f32 %v1505_v41, %v2196_v54 }
 0x328   :  { %v1539_v38 = vmul.f32 %v1519_v32, %v1519_v32  ;;  %v1540_v39 = vmul.f32 %v1520_v28, %v1520_v28  ;;  %v1541_v44 = vmul.f32 %v1521_v37, %v1521_v37  ;;  %v1542_v47 = vmul.f32 %v1522_v26, %v1522_v26 }
 0x329   :  { %v1543_v59 = vmul.f32 %v1523_v42, %v1523_v42  ;;  %v1508_v61 = vsub.f32 %v2246_v33, %v2300_v24  ;;  %v1526_v63 = vmul.f32 %v1506_v29, %v2199_v56  ;;  %v1544_v4 = vmul.f32 %v1524_v46, %v1524_v46 }
 0x32a   :  { %v1559_v45 = vadd.f32 %v1540_v39, %v1539_v38  ;;  %v1509_v7 = vsub.f32 %v2249_v35, %v2300_v24  ;;  %v1527_v9 = vmul.f32 %v1507_v55, %v2214_v2  ;;  %v1545_v10 = vmul.f32 %v1525_v58, %v1525_v58 }
 0x32b   :  { %v1510_v17 = vsub.f32 %v2256_v30, %v2300_v24  ;;  %v1528_v18 = vmul.f32 %v1508_v61, %v2218_v6  ;;  %v1546_v19 = vmul.f32 %v1526_v63, %v1526_v63  ;;  %v1511_v15 = vsub.f32 %v2261_v48, %v2300_v24 }
 0x32c   :  { %v1560_v49 = vadd.f32 %v1559_v45, %v1541_v44  ;;  %v1529_v20 = vmul.f32 %v1509_v7, %v2188_v51  ;;  %v1547_v8 = vmul.f32 %v1527_v9, %v1527_v9  ;;  %v1512_v31 = vsub.f32 %v2264_v43, %v2300_v24 }
 0x32d   :  { %v1530_v32 = vmul.f32 %v1510_v17, %v2196_v54  ;;  %v1548_v28 = vmul.f32 %v1528_v18, %v1528_v18  ;;  %v1513_v34 = vsub.f32 %v2271_v36, %v2300_v24  ;;  %v1531_v37 = vmul.f32 %v1511_v15, %v2199_v56 }
 0x32e   :  { %v1561_v60 = vadd.f32 %v1560_v49, %v1542_v47  ;;  %v1549_v38 = vmul.f32 %v1529_v20, %v1529_v20  ;;  %v1514_v40 = vsub.f32 %v2274_v50, %v2300_v24  ;;  %v1532_v26 = vmul.f32 %v1512_v31, %v2214_v2 }
 0x32f   :  { %v1550_v41 = vmul.f32 %v1530_v32, %v1530_v32  ;;  %v1515_v44 = vsub.f32 %v2281_v62, %v2300_v24  ;;  %v1533_v45 = vmul.f32 %v1513_v34, %v2218_v6  ;;  %v1551_v29 = vmul.f32 %v1531_v37, %v1531_v37 }
 0x330   :  { %v1562_v5 = vadd.f32 %v1561_v60, %v1543_v59  ;;  %v1516_v47 = vsub.f32 %v2284_v3, %v2300_v24  ;;  %v1534_v49 = vmul.f32 %v1514_v40, %v2188_v51  ;;  %v1552_v55 = vmul.f32 %v1532_v26, %v1532_v26 }
 0x331   :  { %v1517_v59 = vsub.f32 %v2291_v12, %v2300_v24  ;;  %v1535_v60 = vmul.f32 %v1515_v44, %v2196_v54  ;;  %v1553_v61 = vmul.f32 %v1533_v45, %v1533_v45 }
 0x332   :  { %v1563_v14 = vadd.f32 %v1562_v5, %v1544_v4  ;;  %v1518_v4 = vsub.f32 %v2294_v16, %v2300_v24  ;;  %v1536_v5 = vmul.f32 %v1516_v47, %v2199_v56  ;;  %v1554_v7 = vmul.f32 %v1534_v49, %v1534_v49  ;;  %v1583_v56 = vld [vmem:[%s2571_s5] sm:$0xff] }
 0x334   :  { %v1564_v1 = vadd.f32 %v1563_v14, %v1545_v10  ;;  %v1537_v10 = vmul.f32 %v1517_v59, %v2214_v2  ;;  %v1555_v14 = vmul.f32 %v1535_v60, %v1535_v60  ;;  %v1538_v17 = vmul.f32 %v1518_v4, %v2218_v6  ;;  %v1585_v6 = vld [vmem:[%s2572_s6] sm:$0xff] }
 0x335   :  { %v1556_v18 = vmul.f32 %v1536_v5, %v1536_v5 }
 0x336   :  { %v1565_v25 = vadd.f32 %v1564_v1, %v1546_v19  ;;  %v1557_v1 = vmul.f32 %v1537_v10, %v1537_v10  ;;  %v1558_v54 = vmul.f32 %v1538_v17, %v1538_v17 }
 0x338   :  { %v1566_v23 = vadd.f32 %v1565_v25, %v1547_v8 }
 0x33a   :  { %v1567_v39 = vadd.f32 %v1566_v23, %v1548_v28 }
 0x33c   :  { %v1568_v42 = vadd.f32 %v1567_v39, %v1549_v38 }
 0x33e   :  { %v1569_v46 = vadd.f32 %v1568_v42, %v1550_v41 }
 0x340   :  { %v1570_v58 = vadd.f32 %v1569_v46, %v1551_v29 }
 0x342   :  { %v1571_v63 = vadd.f32 %v1570_v58, %v1552_v55 }
 0x344   :  { %v1572_v9 = vadd.f32 %v1571_v63, %v1553_v61 }
 0x346   :  { %v1573_v51 = vadd.f32 %v1572_v9, %v1554_v7 }
 0x348   :  { %v1574_v19 = vadd.f32 %v1573_v51, %v1555_v14 }
 0x34a   :  { %v1575_v15 = vadd.f32 %v1574_v19, %v1556_v18 }
 0x34c   :  { %v1576_v20 = vadd.f32 %v1575_v15, %v1557_v1 }
 0x34e   :  { %v1577_v8 = vadd.f32 %v1576_v20, %v1558_v54 }
 0x350   :  { %1578 = vadd.xlane.f32.xlu1 %v1577_v8 }
 0x3dd   :  { %v1579_v25 = vpop.xlane.xlu1 %1578 }
 0x3de   :  { %v1580_v31 = vmul.f32 0.00048828125, %v1579_v25 }
 0x3e0   :  { %v1581_v32 = vadd.f32 1e-05, %v1580_v31 }
 0x3e2   :  { %1792 = vrsqrt.f32 %v1581_v32 }
 0x3ec   :  { %v1793_v2 = vpop.eup %1792 }
 0x3ed   :  { %v1584_v28 = vmul.f32 %v1793_v2, %v1583_v56 }
 0x3ef   :  { %1590 = vperm.xlu0 %1791, %v1584_v28   ;;  %v1586_v23 = vmul.f32 %v1584_v28, %v2300_v24 }
 0x3f1   :  { %v1587_v34 = vsub.f32 %v1585_v6, %v1586_v23 }
 0x3f3   :  { %1615 = vperm.xlu1 %1790, %v1587_v34  }
 0x46e   :  { %v1591_v37 = vpop.permute.xlu0 %1590 }
 0x46f   :  { %v1593_v38 = vmul.f32 %v1591_v37, %v2191_v52  ;;  %v1594_v39 = vmul.f32 %v1591_v37, %v2194_v53  ;;  %v1595_v40 = vmul.f32 %v1591_v37, %v2202_v57  ;;  %v1596_v26 = vmul.f32 %v1591_v37, %v2212_v0 }
 0x470   :  { %v1597_v41 = vmul.f32 %v1591_v37, %v2221_v22  ;;  %v1598_v42 = vmul.f32 %v1591_v37, %v2224_v11  ;;  %v1599_v44 = vmul.f32 %v1591_v37, %v2231_v13  ;;  %v1600_v45 = vmul.f32 %v1591_v37, %v2236_v21 }
 0x471   :  { %v1601_v24 = vmul.f32 %v1591_v37, %v2241_v27  ;;  %v1602_v29 = vmul.f32 %v1591_v37, %v2246_v33  ;;  %v1603_v52 = vmul.f32 %v1591_v37, %v2249_v35  ;;  %v1604_v53 = vmul.f32 %v1591_v37, %v2256_v30 }
 0x472   :  { %v1605_v57 = vmul.f32 %v1591_v37, %v2261_v48  ;;  %v1606_v0 = vmul.f32 %v1591_v37, %v2264_v43  ;;  %v1607_v22 = vmul.f32 %v1591_v37, %v2271_v36  ;;  %v1608_v11 = vmul.f32 %v1591_v37, %v2274_v50  ;;  %v1616_v46 = vpop.permute.xlu1 %1615 }
 0x473   :  { %v1609_v13 = vmul.f32 %v1591_v37, %v2281_v62  ;;  %v1610_v21 = vmul.f32 %v1591_v37, %v2284_v3  ;;  %v1611_v27 = vmul.f32 %v1591_v37, %v2291_v12  ;;  %v1612_v33 = vmul.f32 %v1591_v37, %v2294_v16 }
 0x474   :  { %v1618_v35 = vadd.f32 %v1616_v46, %v1593_v38  ;;  %v1619_v47 = vadd.f32 %v1616_v46, %v1594_v39  ;;  %v1620_v30 = vadd.f32 %v1616_v46, %v1595_v40  ;;  %v1621_v49 = vadd.f32 %v1616_v46, %v1596_v26 }
 0x475   :  { %v2389_v48 = vadd.f32 %v1616_v46, %v1597_v41  ;;  %v2391_v43 = vadd.f32 %v1616_v46, %v1598_v42  ;;  %v2393_v36 = vadd.f32 %v1616_v46, %v1599_v44  ;;  %v2395_v50 = vadd.f32 %v1616_v46, %v1600_v45 }
 0x476   :  { %v2397_v55 = vadd.f32 %v1616_v46, %v1601_v24  ;;  %v2399_v62 = vadd.f32 %v1616_v46, %v1602_v29  ;;  %v2401_v3 = vadd.f32 %v1616_v46, %v1603_v52  ;;  %v2403_v12 = vadd.f32 %v1616_v46, %v1604_v53 }
 0x477   :  { %v2405_v16 = vadd.f32 %v1616_v46, %v1605_v57  ;;  %v2407_v58 = vadd.f32 %v1616_v46, %v1606_v0  ;;  %v2409_v59 = vadd.f32 %v1616_v46, %v1607_v22  ;;  %v2411_v60 = vadd.f32 %v1616_v46, %v1608_v11 }
 0x478   :  { %v2413_v61 = vadd.f32 %v1616_v46, %v1609_v13  ;;  %v2415_v63 = vadd.f32 %v1616_v46, %v1610_v21  ;;  %v2417_v4 = vadd.f32 %v1616_v46, %v1611_v27  ;;  %v2419_v5 = vadd.f32 %v1616_v46, %v1612_v33 }
 0x479   :  { %vm1638_vm5 = vcmp.gt.f32.partialorder %v1618_v35, 0.0  ;;  %vm1639_vm6 = vcmp.gt.f32.partialorder %v1619_v47, 0.0  ;;  %vm1640_vm7 = vcmp.gt.f32.partialorder %v1620_v30, 0.0  ;;  %vm1641_vm8 = vcmp.gt.f32.partialorder %v1621_v49, 0.0 }
 0x47a   :  { %vm1642_vm9 = vcmp.gt.f32.partialorder %v2389_v48, 0.0  ;;  %vm1643_vm10 = vcmp.gt.f32.partialorder %v2391_v43, 0.0  ;;  %vm1648_vm15 = vcmp.gt.f32.partialorder %v2401_v3, 0.0  ;;  %vm1649_vm0 = vcmp.gt.f32.partialorder %v2403_v12, 0.0 }
 0x47b   :  { %vm1650_vm1 = vcmp.gt.f32.partialorder %v2405_v16, 0.0  ;;  %vm1651_vm2 = vcmp.gt.f32.partialorder %v2407_v58, 0.0  ;;  %vm1652_vm3 = vcmp.gt.f32.partialorder %v2409_v59, 0.0  ;;  %vm1653_vm4 = vcmp.gt.f32.partialorder %v2411_v60, 0.0 }
 0x47c   :  { %vm1654_vm11 = vcmp.gt.f32.partialorder %v2413_v61, 0.0  ;;  %vm1655_vm12 = vcmp.gt.f32.partialorder %v2415_v63, 0.0  ;;  %vm1656_vm13 = vcmp.gt.f32.partialorder %v2417_v4, 0.0  ;;  %vm1657_vm14 = vcmp.gt.f32.partialorder %v2419_v5, 0.0 }
 0x47d   :  { %v1658_v7 = vmul.f32 0.01, %v1618_v35  ;;  %v1659_v9 = vmul.f32 0.01, %v1619_v47  ;;  %v1660_v10 = vmul.f32 0.01, %v1620_v30 }
 0x47e   :  { %v1661_v14 = vmul.f32 0.01, %v1621_v49  ;;  %v1662_v51 = vmul.f32 0.01, %v2389_v48  ;;  %v1663_v17 = vmul.f32 0.01, %v2391_v43 }
 0x47f   :  { %v1664_v18 = vmul.f32 0.01, %v2393_v36  ;;  %v1665_v19 = vmul.f32 0.01, %v2395_v50  ;;  %v1666_v1 = vmul.f32 0.01, %v2397_v55  ;;  %v1678_v15 = vsel %vm1638_vm5, %v1618_v35, %v1658_v7 }
 0x480   :  { %v1667_v54 = vmul.f32 0.01, %v2399_v62  ;;  %v1668_v20 = vmul.f32 0.01, %v2401_v3  ;;  %v1669_v8 = vmul.f32 0.01, %v2403_v12  ;;  %v1679_v25 = vsel %vm1639_vm6, %v1619_v47, %v1659_v9  ;;  %1698 = vst [vmem:[%s2573_s8] sm:$0xff] %v1678_v15 }
 0x481   :  { %v1670_v31 = vmul.f32 0.01, %v2405_v16  ;;  %v1671_v32 = vmul.f32 0.01, %v2407_v58  ;;  %v1672_v56 = vmul.f32 0.01, %v2409_v59  ;;  %v1680_v2 = vsel %vm1640_vm7, %v1620_v30, %v1660_v10 }
 0x482   :  { %1699 = vst [vmem:[%s2573_s8 + $0x8] sm:$0xff] %v1679_v25  ;;  %v1673_v28 = vmul.f32 0.01, %v2411_v60  ;;  %v1674_v6 = vmul.f32 0.01, %v2413_v61  ;;  %v1681_v34 = vsel %vm1641_vm8, %v1621_v49, %v1661_v14  ;;  %1700 = vst [vmem:[%s2573_s8 + $0x10] sm:$0xff] %v1680_v2  ;;  %v1682_v39 = vsel %vm1642_vm9, %v2389_v48, %v1662_v51 }
 0x483   :  { %v1675_v23 = vmul.f32 0.01, %v2415_v63  ;;  %v1676_v37 = vmul.f32 0.01, %v2417_v4  ;;  %v1677_v38 = vmul.f32 0.01, %v2419_v5  ;;  %v1683_v40 = vsel %vm1643_vm10, %v2391_v43, %v1663_v17 }
 0x484   :  { %1701 = vst [vmem:[%s2573_s8 + $0x18] sm:$0xff] %v1681_v34  ;;  %vm2574_vm5 = vcmp.gt.f32.partialorder %v2393_v36, 0.0  ;;  %vm2575_vm6 = vcmp.gt.f32.partialorder %v2395_v50, 0.0  ;;  %vm2576_vm7 = vcmp.gt.f32.partialorder %v2397_v55, 0.0  ;;  %vm2577_vm8 = vcmp.gt.f32.partialorder %v2399_v62, 0.0  ;;  %1702 = vst [vmem:[%s2573_s8 + $0x20] sm:$0xff] %v1682_v39 }
 0x485   :  { %v1684_v26 = vsel %vm2574_vm5, %v2393_v36, %v1664_v18  ;;  %v1685_v41 = vsel %vm2575_vm6, %v2395_v50, %v1665_v19  ;;  %v1686_v42 = vsel %vm2576_vm7, %v2397_v55, %v1666_v1  ;;  %v1687_v44 = vsel %vm2577_vm8, %v2399_v62, %v1667_v54  ;;  %1703 = vst [vmem:[%s2573_s8 + $0x28] sm:$0xff] %v1683_v40 }
 0x486   :  { %v1688_v45 = vsel %vm1648_vm15, %v2401_v3, %v1668_v20  ;;  %v1689_v24 = vsel %vm1649_vm0, %v2403_v12, %v1669_v8  ;;  %v1690_v29 = vsel %vm1650_vm1, %v2405_v16, %v1670_v31  ;;  %v1691_v52 = vsel %vm1651_vm2, %v2407_v58, %v1671_v32  ;;  %1704 = vst [vmem:[%s2573_s8 + $0x30] sm:$0xff] %v1684_v26 }
 0x487   :  { %1705 = vst [vmem:[%s2573_s8 + $0x38] sm:$0xff] %v1685_v41  ;;  %1706 = vst [vmem:[%s2573_s8 + $0x40] sm:$0xff] %v1686_v42  ;;  %v1692_v53 = vsel %vm1652_vm3, %v2409_v59, %v1672_v56  ;;  %v1693_v57 = vsel %vm1653_vm4, %v2411_v60, %v1673_v28  ;;  %v1694_v0 = vsel %vm1654_vm11, %v2413_v61, %v1674_v6 }
 0x488   :  { %1707 = vst [vmem:[%s2573_s8 + $0x48] sm:$0xff] %v1687_v44  ;;  %v1695_v22 = vsel %vm1655_vm12, %v2415_v63, %v1675_v23  ;;  %1708 = vst [vmem:[%s2573_s8 + $0x50] sm:$0xff] %v1688_v45  ;;  %v1696_v11 = vsel %vm1656_vm13, %v2417_v4, %v1676_v37  ;;  %v1697_v46 = vsel %vm1657_vm14, %v2419_v5, %v1677_v38 }
 0x489   :  { %1709 = vst [vmem:[%s2573_s8 + $0x58] sm:$0xff] %v1689_v24  ;;  %1710 = vst [vmem:[%s2573_s8 + $0x60] sm:$0xff] %v1690_v29 }
 0x48a   :  { %1711 = vst [vmem:[%s2573_s8 + $0x68] sm:$0xff] %v1691_v52  ;;  %1712 = vst [vmem:[%s2573_s8 + $0x70] sm:$0xff] %v1692_v53 }
 0x48b   :  { %1713 = vst [vmem:[%s2573_s8 + $0x78] sm:$0xff] %v1693_v57  ;;  %1714 = vst [vmem:[%s2573_s8 + $0x80] sm:$0xff] %v1694_v0 }
 0x48c   :  { %1715 = vst [vmem:[%s2573_s8 + $0x88] sm:$0xff] %v1695_v22  ;;  %1716 = vst [vmem:[%s2573_s8 + $0x90] sm:$0xff] %v1696_v11 }
 0x48d   :  { %1717 = vst [vmem:[%s2573_s8 + $0x98] sm:$0xff] %v1697_v46 }

</bundles_post_ra>
